<compile_context>
chip_gen: v6e
topology: v6e:2x2x1
jax: 0.10.0
libtpu: 0.0.40
codegen_flags: <defaults>
</compile_context>

<pallas_src>
import functools

import numpy as np
import jax
import jax.numpy as jnp
from jax.experimental import pallas as pl
from jax.experimental.pallas import tpu as pltpu


_LANE = 128  # lane-aligned zero-extension width used for the shifted views


def _div_mod(v, c):
    """v // c, v % c for a traced int32 array and a static positive int."""
    if c & (c - 1) == 0:  # power of two -> shifts/masks (always lowers)
        s = c.bit_length() - 1
        return v >> s, v & (c - 1)
    return v // c, v % c


# ---------------------------------------------------------------------------
# Kernel A: fused 3x3 "transposed" conv (stride 1, pad 1) + 2x2 max-pool with
#           PyTorch-style indices + per-image BN statistics.
# Layout: channel-major, spatial flattened on the lane axis.
#   x_ref      : (1, Cin_p, H*W)      one image, channels sublane, H*W lanes
#   w_ref      : (Cout, 9*Cin_p)      taps+channels flattened (one MXU pass)
#   b_ref      : (Cout, 1)            conv bias
#   pooled_ref : (1, Cout, Hp*Wp)     max-pooled conv output (NCHW-flat)
#   idx_ref    : (1, Cout, Hp*Wp)     flat argmax index into the HxW plane
#   ssum_ref   : (1, Cout, 1)         per-image per-channel sum of pooled
#   ssq_ref    : (1, Cout, 1)         per-image per-channel sum of pooled^2
# ---------------------------------------------------------------------------
def conv_pool_stats_kernel(x_ref, w_ref, b_ref,
                           pooled_ref, idx_ref, ssum_ref, ssq_ref,
                           *, H, W, Hp, Wp):
    Cin_p = x_ref.shape[1]
    Cout = pooled_ref.shape[1]
    HW = H * W
    HpWp = Hp * Wp

    x = x_ref[0]                                      # (Cin_p, H*W)

    # ---- im2col slab via lane shifts (single fused matmul) ------------------
    pos = jax.lax.broadcasted_iota(jnp.int32, (Cin_p, HW), 1)
    hh, ww = _div_mod(pos, W)                         # row / col of each lane
    zpad = jnp.zeros((Cin_p, _LANE), jnp.float32)
    xz = jnp.concatenate([zpad, x, zpad], axis=1)     # lane-aligned concat

    parts = []
    for dh in (-1, 0, 1):
        for dw in (-1, 0, 1):
            d = dh * W + dw
            shifted = xz[:, _LANE + d:_LANE + d + HW]             # x_flat[p+d]
            valid = ((hh + dh >= 0) & (hh + dh < H) &
                     (ww + dw >= 0) & (ww + dw < W))
            parts.append(jnp.where(valid, shifted, 0.0))
    # sublane-aligned concat (each piece is Cin_p = multiple-of-8 rows)
    slab = jnp.concatenate(parts, axis=0)             # (9*Cin_p, H*W)

    # One MXU pass; bias folded in right after (no zeros+add accumulator).
    conv = jnp.dot(w_ref[...], slab, preferred_element_type=jnp.float32)
    conv = conv + b_ref[...]                          # (Cout, H*W)

    # ---- 2x2 max-pool with flat argmax indices ------------------------------
    # For a window anchored at even (h, w), candidates sit at flat offsets
    # 0, 1, W, W+1.  Non-anchor lanes compute garbage and are discarded by the
    # compaction matmul below.  Strict '>' => first max wins (matches ref).
    czpad = jnp.zeros((Cout, _LANE), jnp.float32)
    cz = jnp.concatenate([conv, czpad], axis=1)
    best_val = conv
    best_off = jnp.zeros((Cout, HW), jnp.float32)
    for off in (1, W, W + 1):                         # PyTorch window scan order
        cand = cz[:, off:off + HW]
        take = cand > best_val
        best_val = jnp.where(take, cand, best_val)
        best_off = jnp.where(take, jnp.float32(off), best_off)

    # Compaction: pick the Hp*Wp anchor lanes via an exact 0/1 selection
    # matmul on the (otherwise idle) MXU instead of strided lane gathers.
    p_i = jax.lax.broadcasted_iota(jnp.int32, (HW, HpWp), 0)
    j_i = jax.lax.broadcasted_iota(jnp.int32, (HW, HpWp), 1)
    j_h, j_w = _div_mod(j_i, Wp)
    anchors = j_h * (2 * W) + j_w * 2                 # top-left of window j
    sel = jnp.where(p_i == anchors, 1.0, 0.0)         # (H*W, Hp*Wp)

    pooled = jnp.dot(best_val, sel, preferred_element_type=jnp.float32)
    off_c = jnp.dot(best_off, sel, preferred_element_type=jnp.float32)

    jj = jax.lax.broadcasted_iota(jnp.int32, (Cout, HpWp), 1)
    o_h, o_w = _div_mod(jj, Wp)
    anchor_out = o_h * (2 * W) + o_w * 2
    idx = anchor_out + off_c.astype(jnp.int32)        # PyTorch flat index h*W+w

    pooled_ref[0] = pooled
    idx_ref[0] = idx

    # ---- per-image, per-channel sums for BatchNorm (no second full pass) ----
    ones_col = jnp.ones((HpWp, 1), jnp.float32)
    ssum_ref[0] = jnp.dot(pooled, ones_col, preferred_element_type=jnp.float32)
    ssq_ref[0] = jnp.dot(pooled * pooled, ones_col,
                         preferred_element_type=jnp.float32)


# ---------------------------------------------------------------------------
# Kernel B: apply BatchNorm (training-mode batch stats) as y = x*scale + shift.
# Tiled over N (grid >= 2 "parallel" steps => both v7x TensorCores).
# ---------------------------------------------------------------------------
def bn_apply_kernel(x_ref, scale_ref, shift_ref, out_ref):
    # x_ref: (1, Cout, Hp*Wp); scale/shift: (Cout, 1) broadcast over lanes.
    out_ref[0] = x_ref[0] * scale_ref[...] + shift_ref[...]


# ---------------------------------------------------------------------------
# Wrapper
# ---------------------------------------------------------------------------
def decoder_block_forward(x_nchw, wt, bias, gamma, beta):
    """x_nchw: (N, Cin, H, W) f32.  wt: (Cin, Cout, 3, 3) ConvTranspose2d weight.
    Returns (bn_out NCHW f32, mp_idx NCHW int32) matching PyTorch semantics."""
    N, Cin, H, W = x_nchw.shape
    Cout = wt.shape[1]
    assert H % 2 == 0 and W % 2 == 0
    Hp, Wp = H // 2, W // 2
    HW, HpWp = H * W, Hp * Wp
    Cin_p = ((Cin + 7) // 8) * 8            # sublane-align the contraction dim

    # Free contiguous reshape (no transpose, no HBM copy beyond the tiny pad
    # of Cin -> Cin_p for sublane alignment of the fused contraction).
    x_flat = x_nchw.reshape(N, Cin, HW)
    if Cin_p != Cin:
        x_flat = jnp.pad(x_flat, ((0, 0), (0, Cin_p - Cin), (0, 0)))

    # ConvTranspose2d(k=3, s=1, p=1) == Conv2d(p=1) with the kernel spatially
    # flipped and in/out channels swapped.  Flatten taps+channels into one
    # 2-D weight tile so the kernel issues a single MXU matmul.
    w_flip = jnp.flip(wt, axis=(2, 3))                  # (Cin, Cout, 3, 3)
    w_t = jnp.transpose(w_flip, (1, 2, 3, 0))           # (Cout, 3, 3, Cin)
    if Cin_p != Cin:
        w_t = jnp.pad(w_t, ((0, 0), (0, 0), (0, 0), (0, Cin_p - Cin)))
    w2 = w_t.reshape(Cout, 9 * Cin_p)
    b2 = bias.reshape(Cout, 1)

    kernel_a = functools.partial(conv_pool_stats_kernel, H=H, W=W, Hp=Hp, Wp=Wp)
    pooled, idx, ssum, ssq = pl.pallas_call(
        kernel_a,
        out_shape=(jax.ShapeDtypeStruct((N, Cout, HpWp), jnp.float32),
                   jax.ShapeDtypeStruct((N, Cout, HpWp), jnp.int32),
                   jax.ShapeDtypeStruct((N, Cout, 1), jnp.float32),
                   jax.ShapeDtypeStruct((N, Cout, 1), jnp.float32)),
        grid=(N,),
        in_specs=[pl.BlockSpec((1, Cin_p, HW), lambda n: (n, 0, 0)),
                  pl.BlockSpec((Cout, 9 * Cin_p), lambda n: (0, 0)),
                  pl.BlockSpec((Cout, 1), lambda n: (0, 0))],
        out_specs=(pl.BlockSpec((1, Cout, HpWp), lambda n: (n, 0, 0)),
                   pl.BlockSpec((1, Cout, HpWp), lambda n: (n, 0, 0)),
                   pl.BlockSpec((1, Cout, 1), lambda n: (n, 0, 0)),
                   pl.BlockSpec((1, Cout, 1), lambda n: (n, 0, 0))),
        compiler_params=pltpu.CompilerParams(
            dimension_semantics=("parallel",),
            vmem_limit_bytes=32 * 1024 * 1024),
    )(x_flat, w2, b2)

    # Tiny cross-image stat combine (BatchNorm training mode: batch statistics,
    # biased variance) -> per-channel affine for the normalize kernel.
    cnt = jnp.float32(N * HpWp)
    mean = jnp.sum(ssum[:, :, 0], axis=0) / cnt
    ex2 = jnp.sum(ssq[:, :, 0], axis=0) / cnt
    var = ex2 - mean * mean
    inv = jax.lax.rsqrt(var + 1e-5)
    scale = (gamma * inv).reshape(Cout, 1)
    shift = (beta - mean * gamma * inv).reshape(Cout, 1)

    bn_flat = pl.pallas_call(
        bn_apply_kernel,
        out_shape=jax.ShapeDtypeStruct((N, Cout, HpWp), jnp.float32),
        grid=(N,),
        in_specs=[pl.BlockSpec((1, Cout, HpWp), lambda n: (n, 0, 0)),
                  pl.BlockSpec((Cout, 1), lambda n: (0, 0)),
                  pl.BlockSpec((Cout, 1), lambda n: (0, 0))],
        out_specs=pl.BlockSpec((1, Cout, HpWp), lambda n: (n, 0, 0)),
        compiler_params=pltpu.CompilerParams(
            dimension_semantics=("parallel",),
            vmem_limit_bytes=32 * 1024 * 1024),
    )(pooled, scale, shift)

    # Free reshapes back to NCHW (channel-major layout => no transposes).
    return bn_flat.reshape(N, Cout, Hp, Wp), idx.reshape(N, Cout, Hp, Wp)


# ---------------------------------------------------------------------------
# Reference (plain numpy) for the correctness check
# ---------------------------------------------------------------------------
def reference_forward(x, wt, bias, gamma, beta):
    N, Cin, H, W = x.shape
    Cout = wt.shape[1]
    Hp, Wp = H // 2, W // 2
    xpad = np.pad(x, ((0, 0), (0, 0), (1, 1), (1, 1)))
    conv = np.zeros((N, Cout, H, W), np.float64)
    for co in range(Cout):
        for ci in range(Cin):
            for kh in range(3):
                for kw in range(3):
                    conv[:, co] += (xpad[:, ci, kh:kh + H, kw:kw + W]
                                    * wt[ci, co, 2 - kh, 2 - kw])
        conv[:, co] += bias[co]
    # 2x2 max pool with flat indices, first-max tie break
    yi, xi = np.meshgrid(np.arange(Hp), np.arange(Wp), indexing="ij")
    best_val = np.full((N, Cout, Hp, Wp), -np.inf)
    best_idx = np.zeros((N, Cout, Hp, Wp), np.int64)
    for dy in range(2):
        for dx in range(2):
            cand = conv[:, :, dy::2, dx::2]
            cidx = (2 * yi + dy) * W + (2 * xi + dx)
            take = cand > best_val
            best_val = np.where(take, cand, best_val)
            best_idx = np.where(take, np.broadcast_to(cidx, best_idx.shape),
                                best_idx)
    mean = best_val.mean(axis=(0, 2, 3), keepdims=True)
    var = best_val.var(axis=(0, 2, 3), keepdims=True)     # biased, like BN train
    bn = ((best_val - mean) / np.sqrt(var + 1e-5)
          * gamma[None, :, None, None] + beta[None, :, None, None])
    return bn, best_idx


if __name__ == "__main__":
    # Small shapes consistent with the module: batch=2, inp_features=4,
    # out_features=8, spatial 16x16.
    N, Cin, Cout, H, W = 2, 4, 8, 16, 16

    key = jax.random.PRNGKey(0)
    kx, kw, kb = jax.random.split(key, 3)
    x = jax.random.normal(kx, (N, Cin, H, W), jnp.float32)
    wt = jax.random.normal(kw, (Cin, Cout, 3, 3), jnp.float32) * 0.1
    bias = jax.random.normal(kb, (Cout,), jnp.float32) * 0.1
    gamma = jnp.ones((Cout,), jnp.float32)    # BatchNorm2d default weight
    beta = jnp.zeros((Cout,), jnp.float32)    # BatchNorm2d default bias

    fwd = jax.jit(decoder_block_forward)
    bn_out, mp_idx = fwd(x, wt, bias, gamma, beta)
    bn_out = jax.block_until_ready(bn_out)
    mp_idx = jax.block_until_ready(mp_idx)

    bn_ref, idx_ref = reference_forward(np.asarray(x), np.asarray(wt),
                                        np.asarray(bias), np.asarray(gamma),
                                        np.asarray(beta))
    np.testing.assert_allclose(np.asarray(bn_out), bn_ref, rtol=1e-4, atol=1e-4)
    np.testing.assert_array_equal(np.asarray(mp_idx).astype(np.int64), idx_ref)

    print("KERNEL_OK")
</pallas_src>

<mosaic_0001>
module attributes {stable_mosaic.version = 11 : i64} {
  func.func @bn_apply_kernel(%arg0: i32, %arg1: memref<1x8x64xf32, #tpu.memory_space<vmem>>, %arg2: memref<8x1xf32, #tpu.memory_space<vmem>>, %arg3: memref<8x1xf32, #tpu.memory_space<vmem>>, %arg4: memref<1x8x64xf32, #tpu.memory_space<vmem>>) attributes {dimension_semantics = [#tpu.dimension_semantics<parallel>], iteration_bounds = array<i64: 2>, scalar_prefetch = 0 : i64, scratch_operands = 0 : i64, tpu.core_type = #tpu.core_type<tc>, window_params = [{transform_indices = @transform_0, window_bounds = array<i64: 1, 8, 64>}, {pipeline_mode = #tpu.pipeline_mode<synchronous>, transform_indices = @transform_1, window_bounds = array<i64: 8, 1>}, {pipeline_mode = #tpu.pipeline_mode<synchronous>, transform_indices = @transform_2, window_bounds = array<i64: 8, 1>}, {transform_indices = @transform_3, window_bounds = array<i64: 1, 8, 64>}]} {
    %c0 = arith.constant 0 : index
    %c0_0 = arith.constant 0 : index
    %c0_1 = arith.constant 0 : index
    %0 = vector.load %arg1[%c0, %c0_0, %c0_1] : memref<1x8x64xf32, #tpu.memory_space<vmem>>, vector<1x8x64xf32>
    %1 = vector.shape_cast %0 : vector<1x8x64xf32> to vector<8x64xf32>
    %c0_2 = arith.constant 0 : index
    %c0_3 = arith.constant 0 : index
    %2 = vector.load %arg2[%c0_2, %c0_3] : memref<8x1xf32, #tpu.memory_space<vmem>>, vector<8x1xf32>
    %3 = vector.broadcast %2 : vector<8x1xf32> to vector<8x64xf32>
    %4 = arith.mulf %1, %3 : vector<8x64xf32>
    %c0_4 = arith.constant 0 : index
    %c0_5 = arith.constant 0 : index
    %5 = vector.load %arg3[%c0_4, %c0_5] : memref<8x1xf32, #tpu.memory_space<vmem>>, vector<8x1xf32>
    %6 = vector.broadcast %5 : vector<8x1xf32> to vector<8x64xf32>
    %7 = arith.addf %4, %6 : vector<8x64xf32>
    %c0_6 = arith.constant 0 : index
    %c0_7 = arith.constant 0 : index
    %c0_8 = arith.constant 0 : index
    %8 = vector.load %arg4[%c0_6, %c0_7, %c0_8] : memref<1x8x64xf32, #tpu.memory_space<vmem>>, vector<1x8x64xf32>
    %9 = vector.shape_cast %8 : vector<1x8x64xf32> to vector<8x64xf32>
    %10 = vector.shape_cast %7 : vector<8x64xf32> to vector<1x8x64xf32>
    tpu.vector_store %arg4[%c0_6, %c0_7, %c0_8], %10 {strides = array<i32>} : memref<1x8x64xf32, #tpu.memory_space<vmem>>, vector<1x8x64xf32>,
    return
  }
  func.func @transform_0(%arg0: i32) -> (i32, i32, i32) {
    %c0_i32 = arith.constant 0 : i32
    %c0_i32_0 = arith.constant 0 : i32
    %c0_i32_1 = arith.constant 0 : i32
    return %arg0, %c0_i32, %c0_i32_0 : i32, i32, i32
  }
  func.func @transform_1(%arg0: i32) -> (i32, i32) {
    %c0_i32 = arith.constant 0 : i32
    %c0_i32_0 = arith.constant 0 : i32
    %c0_i32_1 = arith.constant 0 : i32
    return %c0_i32, %c0_i32_0 : i32, i32
  }
  func.func @transform_2(%arg0: i32) -> (i32, i32) {
    %c0_i32 = arith.constant 0 : i32
    %c0_i32_0 = arith.constant 0 : i32
    %c0_i32_1 = arith.constant 0 : i32
    return %c0_i32, %c0_i32_0 : i32, i32
  }
  func.func @transform_3(%arg0: i32) -> (i32, i32, i32) {
    %c0_i32 = arith.constant 0 : i32
    %c0_i32_0 = arith.constant 0 : i32
    %c0_i32_1 = arith.constant 0 : i32
    return %arg0, %c0_i32, %c0_i32_0 : i32, i32, i32
  }
}

module attributes {stable_mosaic.version = 11 : i64} {
  func.func @conv_pool_stats_kernel(%arg0: i32, %arg1: memref<1x8x256xf32, #tpu.memory_space<vmem>>, %arg2: memref<8x72xf32, #tpu.memory_space<vmem>>, %arg3: memref<8x1xf32, #tpu.memory_space<vmem>>, %arg4: memref<1x8x64xf32, #tpu.memory_space<vmem>>, %arg5: memref<1x8x64xi32, #tpu.memory_space<vmem>>, %arg6: memref<1x8x1xf32, #tpu.memory_space<vmem>>, %arg7: memref<1x8x1xf32, #tpu.memory_space<vmem>>) attributes {dimension_semantics = [#tpu.dimension_semantics<parallel>], iteration_bounds = array<i64: 2>, scalar_prefetch = 0 : i64, scratch_operands = 0 : i64, tpu.core_type = #tpu.core_type<tc>, window_params = [{transform_indices = @transform_0, window_bounds = array<i64: 1, 8, 256>}, {pipeline_mode = #tpu.pipeline_mode<synchronous>, transform_indices = @transform_1, window_bounds = array<i64: 8, 72>}, {pipeline_mode = #tpu.pipeline_mode<synchronous>, transform_indices = @transform_2, window_bounds = array<i64: 8, 1>}, {transform_indices = @transform_3, window_bounds = array<i64: 1, 8, 64>}, {transform_indices = @transform_4, window_bounds = array<i64: 1, 8, 64>}, {transform_indices = @transform_5, window_bounds = array<i64: 1, 8, 1>}, {transform_indices = @transform_6, window_bounds = array<i64: 1, 8, 1>}]} {
    %c0 = arith.constant 0 : index
    %c0_0 = arith.constant 0 : index
    %c0_1 = arith.constant 0 : index
    %0 = vector.load %arg1[%c0, %c0_0, %c0_1] : memref<1x8x256xf32, #tpu.memory_space<vmem>>, vector<1x8x256xf32>
    %1 = vector.shape_cast %0 : vector<1x8x256xf32> to vector<8x256xf32>
    %2 = tpu.iota {dimensions = array<i32: 1>} : vector<8x256xi32>
    %c4_i32 = arith.constant 4 : i32
    %3 = vector.broadcast %c4_i32 : i32 to vector<8x256xi32>
    %4 = arith.shrsi %2, %3 : vector<8x256xi32>
    %c15_i32 = arith.constant 15 : i32
    %5 = vector.broadcast %c15_i32 : i32 to vector<8x256xi32>
    %6 = arith.andi %2, %5 : vector<8x256xi32>
    %cst = arith.constant 0.000000e+00 : f32
    %7 = vector.broadcast %cst : f32 to vector<8x128xf32>
    %8 = tpu.concatenate %7, %1, %7 in 1 : vector<8x128xf32>, vector<8x256xf32>, vector<8x128xf32> -> vector<8x512xf32>
    %9 = vector.extract_strided_slice %8 {offsets = [0, 111], sizes = [8, 256], strides = [1, 1]} : vector<8x512xf32> to vector<8x256xf32>
    %c-1_i32 = arith.constant -1 : i32
    %10 = vector.broadcast %c-1_i32 : i32 to vector<8x256xi32>
    %11 = arith.addi %4, %10 : vector<8x256xi32>
    %c0_i32 = arith.constant 0 : i32
    %12 = vector.broadcast %c0_i32 : i32 to vector<8x256xi32>
    %13 = arith.cmpi sge, %11, %12 : vector<8x256xi32>
    %c-1_i32_2 = arith.constant -1 : i32
    %14 = vector.broadcast %c-1_i32_2 : i32 to vector<8x256xi32>
    %15 = arith.addi %4, %14 : vector<8x256xi32>
    %c16_i32 = arith.constant 16 : i32
    %16 = vector.broadcast %c16_i32 : i32 to vector<8x256xi32>
    %17 = arith.cmpi slt, %15, %16 : vector<8x256xi32>
    %18 = arith.andi %13, %17 : vector<8x256xi1>
    %c-1_i32_3 = arith.constant -1 : i32
    %19 = vector.broadcast %c-1_i32_3 : i32 to vector<8x256xi32>
    %20 = arith.addi %6, %19 : vector<8x256xi32>
    %c0_i32_4 = arith.constant 0 : i32
    %21 = vector.broadcast %c0_i32_4 : i32 to vector<8x256xi32>
    %22 = arith.cmpi sge, %20, %21 : vector<8x256xi32>
    %23 = arith.andi %18, %22 : vector<8x256xi1>
    %c-1_i32_5 = arith.constant -1 : i32
    %24 = vector.broadcast %c-1_i32_5 : i32 to vector<8x256xi32>
    %25 = arith.addi %6, %24 : vector<8x256xi32>
    %c16_i32_6 = arith.constant 16 : i32
    %26 = vector.broadcast %c16_i32_6 : i32 to vector<8x256xi32>
    %27 = arith.cmpi slt, %25, %26 : vector<8x256xi32>
    %28 = arith.andi %23, %27 : vector<8x256xi1>
    %cst_7 = arith.constant 0.000000e+00 : f32
    %29 = vector.broadcast %cst_7 : f32 to vector<8x256xf32>
    %30 = arith.select %28, %9, %29 : vector<8x256xi1>, vector<8x256xf32>
    %31 = vector.extract_strided_slice %8 {offsets = [0, 112], sizes = [8, 256], strides = [1, 1]} : vector<8x512xf32> to vector<8x256xf32>
    %c-1_i32_8 = arith.constant -1 : i32
    %32 = vector.broadcast %c-1_i32_8 : i32 to vector<8x256xi32>
    %33 = arith.addi %4, %32 : vector<8x256xi32>
    %c0_i32_9 = arith.constant 0 : i32
    %34 = vector.broadcast %c0_i32_9 : i32 to vector<8x256xi32>
    %35 = arith.cmpi sge, %33, %34 : vector<8x256xi32>
    %c-1_i32_10 = arith.constant -1 : i32
    %36 = vector.broadcast %c-1_i32_10 : i32 to vector<8x256xi32>
    %37 = arith.addi %4, %36 : vector<8x256xi32>
    %c16_i32_11 = arith.constant 16 : i32
    %38 = vector.broadcast %c16_i32_11 : i32 to vector<8x256xi32>
    %39 = arith.cmpi slt, %37, %38 : vector<8x256xi32>
    %40 = arith.andi %35, %39 : vector<8x256xi1>
    %c0_i32_12 = arith.constant 0 : i32
    %41 = vector.broadcast %c0_i32_12 : i32 to vector<8x256xi32>
    %42 = arith.addi %6, %41 : vector<8x256xi32>
    %c0_i32_13 = arith.constant 0 : i32
    %43 = vector.broadcast %c0_i32_13 : i32 to vector<8x256xi32>
    %44 = arith.cmpi sge, %42, %43 : vector<8x256xi32>
    %45 = arith.andi %40, %44 : vector<8x256xi1>
    %c0_i32_14 = arith.constant 0 : i32
    %46 = vector.broadcast %c0_i32_14 : i32 to vector<8x256xi32>
    %47 = arith.addi %6, %46 : vector<8x256xi32>
    %c16_i32_15 = arith.constant 16 : i32
    %48 = vector.broadcast %c16_i32_15 : i32 to vector<8x256xi32>
    %49 = arith.cmpi slt, %47, %48 : vector<8x256xi32>
    %50 = arith.andi %45, %49 : vector<8x256xi1>
    %cst_16 = arith.constant 0.000000e+00 : f32
    %51 = vector.broadcast %cst_16 : f32 to vector<8x256xf32>
    %52 = arith.select %50, %31, %51 : vector<8x256xi1>, vector<8x256xf32>
    %53 = vector.extract_strided_slice %8 {offsets = [0, 113], sizes = [8, 256], strides = [1, 1]} : vector<8x512xf32> to vector<8x256xf32>
    %c-1_i32_17 = arith.constant -1 : i32
    %54 = vector.broadcast %c-1_i32_17 : i32 to vector<8x256xi32>
    %55 = arith.addi %4, %54 : vector<8x256xi32>
    %c0_i32_18 = arith.constant 0 : i32
    %56 = vector.broadcast %c0_i32_18 : i32 to vector<8x256xi32>
    %57 = arith.cmpi sge, %55, %56 : vector<8x256xi32>
    %c-1_i32_19 = arith.constant -1 : i32
    %58 = vector.broadcast %c-1_i32_19 : i32 to vector<8x256xi32>
    %59 = arith.addi %4, %58 : vector<8x256xi32>
    %c16_i32_20 = arith.constant 16 : i32
    %60 = vector.broadcast %c16_i32_20 : i32 to vector<8x256xi32>
    %61 = arith.cmpi slt, %59, %60 : vector<8x256xi32>
    %62 = arith.andi %57, %61 : vector<8x256xi1>
    %c1_i32 = arith.constant 1 : i32
    %63 = vector.broadcast %c1_i32 : i32 to vector<8x256xi32>
    %64 = arith.addi %6, %63 : vector<8x256xi32>
    %c0_i32_21 = arith.constant 0 : i32
    %65 = vector.broadcast %c0_i32_21 : i32 to vector<8x256xi32>
    %66 = arith.cmpi sge, %64, %65 : vector<8x256xi32>
    %67 = arith.andi %62, %66 : vector<8x256xi1>
    %c1_i32_22 = arith.constant 1 : i32
    %68 = vector.broadcast %c1_i32_22 : i32 to vector<8x256xi32>
    %69 = arith.addi %6, %68 : vector<8x256xi32>
    %c16_i32_23 = arith.constant 16 : i32
    %70 = vector.broadcast %c16_i32_23 : i32 to vector<8x256xi32>
    %71 = arith.cmpi slt, %69, %70 : vector<8x256xi32>
    %72 = arith.andi %67, %71 : vector<8x256xi1>
    %cst_24 = arith.constant 0.000000e+00 : f32
    %73 = vector.broadcast %cst_24 : f32 to vector<8x256xf32>
    %74 = arith.select %72, %53, %73 : vector<8x256xi1>, vector<8x256xf32>
    %75 = vector.extract_strided_slice %8 {offsets = [0, 127], sizes = [8, 256], strides = [1, 1]} : vector<8x512xf32> to vector<8x256xf32>
    %c0_i32_25 = arith.constant 0 : i32
    %76 = vector.broadcast %c0_i32_25 : i32 to vector<8x256xi32>
    %77 = arith.addi %4, %76 : vector<8x256xi32>
    %c0_i32_26 = arith.constant 0 : i32
    %78 = vector.broadcast %c0_i32_26 : i32 to vector<8x256xi32>
    %79 = arith.cmpi sge, %77, %78 : vector<8x256xi32>
    %c0_i32_27 = arith.constant 0 : i32
    %80 = vector.broadcast %c0_i32_27 : i32 to vector<8x256xi32>
    %81 = arith.addi %4, %80 : vector<8x256xi32>
    %c16_i32_28 = arith.constant 16 : i32
    %82 = vector.broadcast %c16_i32_28 : i32 to vector<8x256xi32>
    %83 = arith.cmpi slt, %81, %82 : vector<8x256xi32>
    %84 = arith.andi %79, %83 : vector<8x256xi1>
    %c-1_i32_29 = arith.constant -1 : i32
    %85 = vector.broadcast %c-1_i32_29 : i32 to vector<8x256xi32>
    %86 = arith.addi %6, %85 : vector<8x256xi32>
    %c0_i32_30 = arith.constant 0 : i32
    %87 = vector.broadcast %c0_i32_30 : i32 to vector<8x256xi32>
    %88 = arith.cmpi sge, %86, %87 : vector<8x256xi32>
    %89 = arith.andi %84, %88 : vector<8x256xi1>
    %c-1_i32_31 = arith.constant -1 : i32
    %90 = vector.broadcast %c-1_i32_31 : i32 to vector<8x256xi32>
    %91 = arith.addi %6, %90 : vector<8x256xi32>
    %c16_i32_32 = arith.constant 16 : i32
    %92 = vector.broadcast %c16_i32_32 : i32 to vector<8x256xi32>
    %93 = arith.cmpi slt, %91, %92 : vector<8x256xi32>
    %94 = arith.andi %89, %93 : vector<8x256xi1>
    %cst_33 = arith.constant 0.000000e+00 : f32
    %95 = vector.broadcast %cst_33 : f32 to vector<8x256xf32>
    %96 = arith.select %94, %75, %95 : vector<8x256xi1>, vector<8x256xf32>
    %97 = vector.extract_strided_slice %8 {offsets = [0, 128], sizes = [8, 256], strides = [1, 1]} : vector<8x512xf32> to vector<8x256xf32>
    %c0_i32_34 = arith.constant 0 : i32
    %98 = vector.broadcast %c0_i32_34 : i32 to vector<8x256xi32>
    %99 = arith.addi %4, %98 : vector<8x256xi32>
    %c0_i32_35 = arith.constant 0 : i32
    %100 = vector.broadcast %c0_i32_35 : i32 to vector<8x256xi32>
    %101 = arith.cmpi sge, %99, %100 : vector<8x256xi32>
    %c0_i32_36 = arith.constant 0 : i32
    %102 = vector.broadcast %c0_i32_36 : i32 to vector<8x256xi32>
    %103 = arith.addi %4, %102 : vector<8x256xi32>
    %c16_i32_37 = arith.constant 16 : i32
    %104 = vector.broadcast %c16_i32_37 : i32 to vector<8x256xi32>
    %105 = arith.cmpi slt, %103, %104 : vector<8x256xi32>
    %106 = arith.andi %101, %105 : vector<8x256xi1>
    %c0_i32_38 = arith.constant 0 : i32
    %107 = vector.broadcast %c0_i32_38 : i32 to vector<8x256xi32>
    %108 = arith.addi %6, %107 : vector<8x256xi32>
    %c0_i32_39 = arith.constant 0 : i32
    %109 = vector.broadcast %c0_i32_39 : i32 to vector<8x256xi32>
    %110 = arith.cmpi sge, %108, %109 : vector<8x256xi32>
    %111 = arith.andi %106, %110 : vector<8x256xi1>
    %c0_i32_40 = arith.constant 0 : i32
    %112 = vector.broadcast %c0_i32_40 : i32 to vector<8x256xi32>
    %113 = arith.addi %6, %112 : vector<8x256xi32>
    %c16_i32_41 = arith.constant 16 : i32
    %114 = vector.broadcast %c16_i32_41 : i32 to vector<8x256xi32>
    %115 = arith.cmpi slt, %113, %114 : vector<8x256xi32>
    %116 = arith.andi %111, %115 : vector<8x256xi1>
    %cst_42 = arith.constant 0.000000e+00 : f32
    %117 = vector.broadcast %cst_42 : f32 to vector<8x256xf32>
    %118 = arith.select %116, %97, %117 : vector<8x256xi1>, vector<8x256xf32>
    %119 = vector.extract_strided_slice %8 {offsets = [0, 129], sizes = [8, 256], strides = [1, 1]} : vector<8x512xf32> to vector<8x256xf32>
    %c0_i32_43 = arith.constant 0 : i32
    %120 = vector.broadcast %c0_i32_43 : i32 to vector<8x256xi32>
    %121 = arith.addi %4, %120 : vector<8x256xi32>
    %c0_i32_44 = arith.constant 0 : i32
    %122 = vector.broadcast %c0_i32_44 : i32 to vector<8x256xi32>
    %123 = arith.cmpi sge, %121, %122 : vector<8x256xi32>
    %c0_i32_45 = arith.constant 0 : i32
    %124 = vector.broadcast %c0_i32_45 : i32 to vector<8x256xi32>
    %125 = arith.addi %4, %124 : vector<8x256xi32>
    %c16_i32_46 = arith.constant 16 : i32
    %126 = vector.broadcast %c16_i32_46 : i32 to vector<8x256xi32>
    %127 = arith.cmpi slt, %125, %126 : vector<8x256xi32>
    %128 = arith.andi %123, %127 : vector<8x256xi1>
    %c1_i32_47 = arith.constant 1 : i32
    %129 = vector.broadcast %c1_i32_47 : i32 to vector<8x256xi32>
    %130 = arith.addi %6, %129 : vector<8x256xi32>
    %c0_i32_48 = arith.constant 0 : i32
    %131 = vector.broadcast %c0_i32_48 : i32 to vector<8x256xi32>
    %132 = arith.cmpi sge, %130, %131 : vector<8x256xi32>
    %133 = arith.andi %128, %132 : vector<8x256xi1>
    %c1_i32_49 = arith.constant 1 : i32
    %134 = vector.broadcast %c1_i32_49 : i32 to vector<8x256xi32>
    %135 = arith.addi %6, %134 : vector<8x256xi32>
    %c16_i32_50 = arith.constant 16 : i32
    %136 = vector.broadcast %c16_i32_50 : i32 to vector<8x256xi32>
    %137 = arith.cmpi slt, %135, %136 : vector<8x256xi32>
    %138 = arith.andi %133, %137 : vector<8x256xi1>
    %cst_51 = arith.constant 0.000000e+00 : f32
    %139 = vector.broadcast %cst_51 : f32 to vector<8x256xf32>
    %140 = arith.select %138, %119, %139 : vector<8x256xi1>, vector<8x256xf32>
    %141 = vector.extract_strided_slice %8 {offsets = [0, 143], sizes = [8, 256], strides = [1, 1]} : vector<8x512xf32> to vector<8x256xf32>
    %c1_i32_52 = arith.constant 1 : i32
    %142 = vector.broadcast %c1_i32_52 : i32 to vector<8x256xi32>
    %143 = arith.addi %4, %142 : vector<8x256xi32>
    %c0_i32_53 = arith.constant 0 : i32
    %144 = vector.broadcast %c0_i32_53 : i32 to vector<8x256xi32>
    %145 = arith.cmpi sge, %143, %144 : vector<8x256xi32>
    %c1_i32_54 = arith.constant 1 : i32
    %146 = vector.broadcast %c1_i32_54 : i32 to vector<8x256xi32>
    %147 = arith.addi %4, %146 : vector<8x256xi32>
    %c16_i32_55 = arith.constant 16 : i32
    %148 = vector.broadcast %c16_i32_55 : i32 to vector<8x256xi32>
    %149 = arith.cmpi slt, %147, %148 : vector<8x256xi32>
    %150 = arith.andi %145, %149 : vector<8x256xi1>
    %c-1_i32_56 = arith.constant -1 : i32
    %151 = vector.broadcast %c-1_i32_56 : i32 to vector<8x256xi32>
    %152 = arith.addi %6, %151 : vector<8x256xi32>
    %c0_i32_57 = arith.constant 0 : i32
    %153 = vector.broadcast %c0_i32_57 : i32 to vector<8x256xi32>
    %154 = arith.cmpi sge, %152, %153 : vector<8x256xi32>
    %155 = arith.andi %150, %154 : vector<8x256xi1>
    %c-1_i32_58 = arith.constant -1 : i32
    %156 = vector.broadcast %c-1_i32_58 : i32 to vector<8x256xi32>
    %157 = arith.addi %6, %156 : vector<8x256xi32>
    %c16_i32_59 = arith.constant 16 : i32
    %158 = vector.broadcast %c16_i32_59 : i32 to vector<8x256xi32>
    %159 = arith.cmpi slt, %157, %158 : vector<8x256xi32>
    %160 = arith.andi %155, %159 : vector<8x256xi1>
    %cst_60 = arith.constant 0.000000e+00 : f32
    %161 = vector.broadcast %cst_60 : f32 to vector<8x256xf32>
    %162 = arith.select %160, %141, %161 : vector<8x256xi1>, vector<8x256xf32>
    %163 = vector.extract_strided_slice %8 {offsets = [0, 144], sizes = [8, 256], strides = [1, 1]} : vector<8x512xf32> to vector<8x256xf32>
    %c1_i32_61 = arith.constant 1 : i32
    %164 = vector.broadcast %c1_i32_61 : i32 to vector<8x256xi32>
    %165 = arith.addi %4, %164 : vector<8x256xi32>
    %c0_i32_62 = arith.constant 0 : i32
    %166 = vector.broadcast %c0_i32_62 : i32 to vector<8x256xi32>
    %167 = arith.cmpi sge, %165, %166 : vector<8x256xi32>
    %c1_i32_63 = arith.constant 1 : i32
    %168 = vector.broadcast %c1_i32_63 : i32 to vector<8x256xi32>
    %169 = arith.addi %4, %168 : vector<8x256xi32>
    %c16_i32_64 = arith.constant 16 : i32
    %170 = vector.broadcast %c16_i32_64 : i32 to vector<8x256xi32>
    %171 = arith.cmpi slt, %169, %170 : vector<8x256xi32>
    %172 = arith.andi %167, %171 : vector<8x256xi1>
    %c0_i32_65 = arith.constant 0 : i32
    %173 = vector.broadcast %c0_i32_65 : i32 to vector<8x256xi32>
    %174 = arith.addi %6, %173 : vector<8x256xi32>
    %c0_i32_66 = arith.constant 0 : i32
    %175 = vector.broadcast %c0_i32_66 : i32 to vector<8x256xi32>
    %176 = arith.cmpi sge, %174, %175 : vector<8x256xi32>
    %177 = arith.andi %172, %176 : vector<8x256xi1>
    %c0_i32_67 = arith.constant 0 : i32
    %178 = vector.broadcast %c0_i32_67 : i32 to vector<8x256xi32>
    %179 = arith.addi %6, %178 : vector<8x256xi32>
    %c16_i32_68 = arith.constant 16 : i32
    %180 = vector.broadcast %c16_i32_68 : i32 to vector<8x256xi32>
    %181 = arith.cmpi slt, %179, %180 : vector<8x256xi32>
    %182 = arith.andi %177, %181 : vector<8x256xi1>
    %cst_69 = arith.constant 0.000000e+00 : f32
    %183 = vector.broadcast %cst_69 : f32 to vector<8x256xf32>
    %184 = arith.select %182, %163, %183 : vector<8x256xi1>, vector<8x256xf32>
    %185 = vector.extract_strided_slice %8 {offsets = [0, 145], sizes = [8, 256], strides = [1, 1]} : vector<8x512xf32> to vector<8x256xf32>
    %c1_i32_70 = arith.constant 1 : i32
    %186 = vector.broadcast %c1_i32_70 : i32 to vector<8x256xi32>
    %187 = arith.addi %4, %186 : vector<8x256xi32>
    %c0_i32_71 = arith.constant 0 : i32
    %188 = vector.broadcast %c0_i32_71 : i32 to vector<8x256xi32>
    %189 = arith.cmpi sge, %187, %188 : vector<8x256xi32>
    %c1_i32_72 = arith.constant 1 : i32
    %190 = vector.broadcast %c1_i32_72 : i32 to vector<8x256xi32>
    %191 = arith.addi %4, %190 : vector<8x256xi32>
    %c16_i32_73 = arith.constant 16 : i32
    %192 = vector.broadcast %c16_i32_73 : i32 to vector<8x256xi32>
    %193 = arith.cmpi slt, %191, %192 : vector<8x256xi32>
    %194 = arith.andi %189, %193 : vector<8x256xi1>
    %c1_i32_74 = arith.constant 1 : i32
    %195 = vector.broadcast %c1_i32_74 : i32 to vector<8x256xi32>
    %196 = arith.addi %6, %195 : vector<8x256xi32>
    %c0_i32_75 = arith.constant 0 : i32
    %197 = vector.broadcast %c0_i32_75 : i32 to vector<8x256xi32>
    %198 = arith.cmpi sge, %196, %197 : vector<8x256xi32>
    %199 = arith.andi %194, %198 : vector<8x256xi1>
    %c1_i32_76 = arith.constant 1 : i32
    %200 = vector.broadcast %c1_i32_76 : i32 to vector<8x256xi32>
    %201 = arith.addi %6, %200 : vector<8x256xi32>
    %c16_i32_77 = arith.constant 16 : i32
    %202 = vector.broadcast %c16_i32_77 : i32 to vector<8x256xi32>
    %203 = arith.cmpi slt, %201, %202 : vector<8x256xi32>
    %204 = arith.andi %199, %203 : vector<8x256xi1>
    %cst_78 = arith.constant 0.000000e+00 : f32
    %205 = vector.broadcast %cst_78 : f32 to vector<8x256xf32>
    %206 = arith.select %204, %185, %205 : vector<8x256xi1>, vector<8x256xf32>
    %207 = tpu.concatenate %30, %52, %74, %96, %118, %140, %162, %184, %206 in 0 : vector<8x256xf32>, vector<8x256xf32>, vector<8x256xf32>, vector<8x256xf32>, vector<8x256xf32>, vector<8x256xf32>, vector<8x256xf32>, vector<8x256xf32>, vector<8x256xf32> -> vector<72x256xf32>
    %c0_79 = arith.constant 0 : index
    %c0_80 = arith.constant 0 : index
    %208 = vector.load %arg2[%c0_79, %c0_80] : memref<8x72xf32, #tpu.memory_space<vmem>>, vector<8x72xf32>
    %cst_81 = arith.constant dense<0.000000e+00> : vector<8x256xf32>
    %209 = tpu.matmul %208, %207, %cst_81 {dimension_numbers = #tpu.dot_dimension_numbers<[1], [0], [0], [1], [0, 0, 1, 1], [], []>} : vector<8x72xf32>, vector<72x256xf32>, vector<8x256xf32> -> vector<8x256xf32>
    %c0_82 = arith.constant 0 : index
    %c0_83 = arith.constant 0 : index
    %210 = vector.load %arg3[%c0_82, %c0_83] : memref<8x1xf32, #tpu.memory_space<vmem>>, vector<8x1xf32>
    %211 = vector.broadcast %210 : vector<8x1xf32> to vector<8x256xf32>
    %212 = arith.addf %209, %211 : vector<8x256xf32>
    %cst_84 = arith.constant 0.000000e+00 : f32
    %213 = vector.broadcast %cst_84 : f32 to vector<8x128xf32>
    %214 = tpu.concatenate %212, %213 in 1 : vector<8x256xf32>, vector<8x128xf32> -> vector<8x384xf32>
    %cst_85 = arith.constant 0.000000e+00 : f32
    %215 = vector.broadcast %cst_85 : f32 to vector<8x256xf32>
    %216 = vector.extract_strided_slice %214 {offsets = [0, 1], sizes = [8, 256], strides = [1, 1]} : vector<8x384xf32> to vector<8x256xf32>
    %217 = arith.cmpf ogt, %216, %212 : vector<8x256xf32>
    %218 = arith.select %217, %216, %212 : vector<8x256xi1>, vector<8x256xf32>
    %cst_86 = arith.constant 1.000000e+00 : f32
    %219 = vector.broadcast %cst_86 : f32 to vector<8x256xf32>
    %220 = arith.select %217, %219, %215 : vector<8x256xi1>, vector<8x256xf32>
    %221 = vector.extract_strided_slice %214 {offsets = [0, 16], sizes = [8, 256], strides = [1, 1]} : vector<8x384xf32> to vector<8x256xf32>
    %222 = arith.cmpf ogt, %221, %218 : vector<8x256xf32>
    %223 = arith.select %222, %221, %218 : vector<8x256xi1>, vector<8x256xf32>
    %cst_87 = arith.constant 1.600000e+01 : f32
    %224 = vector.broadcast %cst_87 : f32 to vector<8x256xf32>
    %225 = arith.select %222, %224, %220 : vector<8x256xi1>, vector<8x256xf32>
    %226 = vector.extract_strided_slice %214 {offsets = [0, 17], sizes = [8, 256], strides = [1, 1]} : vector<8x384xf32> to vector<8x256xf32>
    %227 = arith.cmpf ogt, %226, %223 : vector<8x256xf32>
    %228 = arith.select %227, %226, %223 : vector<8x256xi1>, vector<8x256xf32>
    %cst_88 = arith.constant 1.700000e+01 : f32
    %229 = vector.broadcast %cst_88 : f32 to vector<8x256xf32>
    %230 = arith.select %227, %229, %225 : vector<8x256xi1>, vector<8x256xf32>
    %231 = tpu.iota {dimensions = array<i32: 0>} : vector<256x64xi32>
    %232 = tpu.iota {dimensions = array<i32: 1>} : vector<256x64xi32>
    %c3_i32 = arith.constant 3 : i32
    %233 = vector.broadcast %c3_i32 : i32 to vector<256x64xi32>
    %234 = arith.shrsi %232, %233 : vector<256x64xi32>
    %c7_i32 = arith.constant 7 : i32
    %235 = vector.broadcast %c7_i32 : i32 to vector<256x64xi32>
    %236 = arith.andi %232, %235 : vector<256x64xi32>
    %c32_i32 = arith.constant 32 : i32
    %237 = vector.broadcast %c32_i32 : i32 to vector<256x64xi32>
    %238 = arith.muli %234, %237 : vector<256x64xi32>
    %c2_i32 = arith.constant 2 : i32
    %239 = vector.broadcast %c2_i32 : i32 to vector<256x64xi32>
    %240 = arith.muli %236, %239 : vector<256x64xi32>
    %241 = arith.addi %238, %240 : vector<256x64xi32>
    %242 = arith.cmpi eq, %231, %241 : vector<256x64xi32>
    %cst_89 = arith.constant 1.000000e+00 : f32
    %cst_90 = arith.constant 0.000000e+00 : f32
    %243 = vector.broadcast %cst_89 : f32 to vector<256x64xf32>
    %244 = vector.broadcast %cst_90 : f32 to vector<256x64xf32>
    %245 = arith.select %242, %243, %244 : vector<256x64xi1>, vector<256x64xf32>
    %cst_91 = arith.constant dense<0.000000e+00> : vector<8x64xf32>
    %246 = tpu.matmul %228, %245, %cst_91 {dimension_numbers = #tpu.dot_dimension_numbers<[1], [0], [0], [1], [0, 0, 1, 1], [], []>} : vector<8x256xf32>, vector<256x64xf32>, vector<8x64xf32> -> vector<8x64xf32>
    %cst_92 = arith.constant dense<0.000000e+00> : vector<8x64xf32>
    %247 = tpu.matmul %230, %245, %cst_92 {dimension_numbers = #tpu.dot_dimension_numbers<[1], [0], [0], [1], [0, 0, 1, 1], [], []>} : vector<8x256xf32>, vector<256x64xf32>, vector<8x64xf32> -> vector<8x64xf32>
    %248 = tpu.iota {dimensions = array<i32: 1>} : vector<8x64xi32>
    %c3_i32_93 = arith.constant 3 : i32
    %249 = vector.broadcast %c3_i32_93 : i32 to vector<8x64xi32>
    %250 = arith.shrsi %248, %249 : vector<8x64xi32>
    %c7_i32_94 = arith.constant 7 : i32
    %251 = vector.broadcast %c7_i32_94 : i32 to vector<8x64xi32>
    %252 = arith.andi %248, %251 : vector<8x64xi32>
    %c32_i32_95 = arith.constant 32 : i32
    %253 = vector.broadcast %c32_i32_95 : i32 to vector<8x64xi32>
    %254 = arith.muli %250, %253 : vector<8x64xi32>
    %c2_i32_96 = arith.constant 2 : i32
    %255 = vector.broadcast %c2_i32_96 : i32 to vector<8x64xi32>
    %256 = arith.muli %252, %255 : vector<8x64xi32>
    %257 = arith.addi %254, %256 : vector<8x64xi32>
    %258 = arith.fptosi %247 : vector<8x64xf32> to vector<8x64xi32>
    %259 = arith.addi %257, %258 : vector<8x64xi32>
    %c0_97 = arith.constant 0 : index
    %c0_98 = arith.constant 0 : index
    %c0_99 = arith.constant 0 : index
    %260 = vector.load %arg4[%c0_97, %c0_98, %c0_99] : memref<1x8x64xf32, #tpu.memory_space<vmem>>, vector<1x8x64xf32>
    %261 = vector.shape_cast %260 : vector<1x8x64xf32> to vector<8x64xf32>
    %262 = vector.shape_cast %246 : vector<8x64xf32> to vector<1x8x64xf32>
    tpu.vector_store %arg4[%c0_97, %c0_98, %c0_99], %262 {strides = array<i32>} : memref<1x8x64xf32, #tpu.memory_space<vmem>>, vector<1x8x64xf32>,
    %c0_100 = arith.constant 0 : index
    %c0_101 = arith.constant 0 : index
    %c0_102 = arith.constant 0 : index
    %263 = vector.load %arg5[%c0_100, %c0_101, %c0_102] : memref<1x8x64xi32, #tpu.memory_space<vmem>>, vector<1x8x64xi32>
    %264 = vector.shape_cast %263 : vector<1x8x64xi32> to vector<8x64xi32>
    %265 = vector.shape_cast %259 : vector<8x64xi32> to vector<1x8x64xi32>
    tpu.vector_store %arg5[%c0_100, %c0_101, %c0_102], %265 {strides = array<i32>} : memref<1x8x64xi32, #tpu.memory_space<vmem>>, vector<1x8x64xi32>,
    %cst_103 = arith.constant 1.000000e+00 : f32
    %266 = vector.broadcast %cst_103 : f32 to vector<64x1xf32>
    %cst_104 = arith.constant dense<0.000000e+00> : vector<8x1xf32>
    %267 = tpu.matmul %246, %266, %cst_104 {dimension_numbers = #tpu.dot_dimension_numbers<[1], [0], [0], [1], [0, 0, 1, 1], [], []>} : vector<8x64xf32>, vector<64x1xf32>, vector<8x1xf32> -> vector<8x1xf32>
    %c0_105 = arith.constant 0 : index
    %c0_106 = arith.constant 0 : index
    %c0_107 = arith.constant 0 : index
    %268 = vector.load %arg6[%c0_105, %c0_106, %c0_107] : memref<1x8x1xf32, #tpu.memory_space<vmem>>, vector<1x8x1xf32>
    %269 = vector.shape_cast %268 : vector<1x8x1xf32> to vector<8x1xf32>
    %270 = vector.shape_cast %267 : vector<8x1xf32> to vector<1x8x1xf32>
    tpu.vector_store %arg6[%c0_105, %c0_106, %c0_107], %270 {strides = array<i32>} : memref<1x8x1xf32, #tpu.memory_space<vmem>>, vector<1x8x1xf32>,
    %271 = arith.mulf %246, %246 : vector<8x64xf32>
    %cst_108 = arith.constant dense<0.000000e+00> : vector<8x1xf32>
    %272 = tpu.matmul %271, %266, %cst_108 {dimension_numbers = #tpu.dot_dimension_numbers<[1], [0], [0], [1], [0, 0, 1, 1], [], []>} : vector<8x64xf32>, vector<64x1xf32>, vector<8x1xf32> -> vector<8x1xf32>
    %c0_109 = arith.constant 0 : index
    %c0_110 = arith.constant 0 : index
    %c0_111 = arith.constant 0 : index
    %273 = vector.load %arg7[%c0_109, %c0_110, %c0_111] : memref<1x8x1xf32, #tpu.memory_space<vmem>>, vector<1x8x1xf32>
    %274 = vector.shape_cast %273 : vector<1x8x1xf32> to vector<8x1xf32>
    %275 = vector.shape_cast %272 : vector<8x1xf32> to vector<1x8x1xf32>
    tpu.vector_store %arg7[%c0_109, %c0_110, %c0_111], %275 {strides = array<i32>} : memref<1x8x1xf32, #tpu.memory_space<vmem>>, vector<1x8x1xf32>,
    return
  }
  func.func @transform_0(%arg0: i32) -> (i32, i32, i32) {
    %c0_i32 = arith.constant 0 : i32
    %c0_i32_0 = arith.constant 0 : i32
    %c0_i32_1 = arith.constant 0 : i32
    return %arg0, %c0_i32, %c0_i32_0 : i32, i32, i32
  }
  func.func @transform_1(%arg0: i32) -> (i32, i32) {
    %c0_i32 = arith.constant 0 : i32
    %c0_i32_0 = arith.constant 0 : i32
    %c0_i32_1 = arith.constant 0 : i32
    return %c0_i32, %c0_i32_0 : i32, i32
  }
  func.func @transform_2(%arg0: i32) -> (i32, i32) {
    %c0_i32 = arith.constant 0 : i32
    %c0_i32_0 = arith.constant 0 : i32
    %c0_i32_1 = arith.constant 0 : i32
    return %c0_i32, %c0_i32_0 : i32, i32
  }
  func.func @transform_3(%arg0: i32) -> (i32, i32, i32) {
    %c0_i32 = arith.constant 0 : i32
    %c0_i32_0 = arith.constant 0 : i32
    %c0_i32_1 = arith.constant 0 : i32
    return %arg0, %c0_i32, %c0_i32_0 : i32, i32, i32
  }
  func.func @transform_4(%arg0: i32) -> (i32, i32, i32) {
    %c0_i32 = arith.constant 0 : i32
    %c0_i32_0 = arith.constant 0 : i32
    %c0_i32_1 = arith.constant 0 : i32
    return %arg0, %c0_i32, %c0_i32_0 : i32, i32, i32
  }
  func.func @transform_5(%arg0: i32) -> (i32, i32, i32) {
    %c0_i32 = arith.constant 0 : i32
    %c0_i32_0 = arith.constant 0 : i32
    %c0_i32_1 = arith.constant 0 : i32
    return %arg0, %c0_i32, %c0_i32_0 : i32, i32, i32
  }
  func.func @transform_6(%arg0: i32) -> (i32, i32, i32) {
    %c0_i32 = arith.constant 0 : i32
    %c0_i32_0 = arith.constant 0 : i32
    %c0_i32_1 = arith.constant 0 : i32
    return %arg0, %c0_i32, %c0_i32_0 : i32, i32, i32
  }
}

</mosaic_0001>

<bundles_post_ra>
// kernel: decoder_block_forward.3
= control target key start
LH: loop header
LB: loop body
LE: loop exit
PB: predicated region body
PF: predicated region fallthrough
CT: control target
= control target key end

     0   :  { %s284_s12 = smov 0   ;;  %s301_s0 = inlined_call_operand.vmem [shape: f32[2,8,64], index: 0, kind: input, shape index: {}]   ;;  %s302_s1 = inlined_call_operand.vmem [shape: f32[8,1], index: 1, kind: input, shape index: {}]   ;;  %s303_s2 = inlined_call_operand.vmem [shape: f32[8,1], index: 2, kind: input, shape index: {}]   ;;  %s304_s3 = inlined_call_operand.vmem [shape: f32[2,8,64], index: 3, kind: output, shape index: {}]  }
   0x1 LB: > { %s236_s13 = sadd.s32 4294967295, %s261_s12   ;;  %p240_p0 = scmp.ge.s32.totalorder %s261_s12, 1  ;;  %s261_s12 = sphi %s284_s12, %s13_s12  }
   0x2   : > { %p136_p1 = scmp.lt.s32.totalorder %s261_s12, 3 }
   0x4   : > { %p137_p2 = pnand %p240_p0, %p136_p1 }
   0x5   : > { %p158_p3 = scmp.lt.s32.totalorder (!%p137_p2), %s236_s13, 1 }
   0x6   : > { %140 = sbr.rel (%p137_p2) target bundleno = 144 (0x90), region = 32 }
   0xb   : > { %v167_v0 = vld [vmem:[%s302_s1] sm:$0xff]  ;;  %v263_v1 = vmov 0   ;;  %s306_s13 = smov (!%p158_p3, %s236_s13), 1  ;;  %vm181_vm0 = vcmask 523264  }
   0xc   : > { %254 = vset.pattern.permute.xlu0 %v263_v1  ;;  %v174_v2 = vld [vmem:[%s303_s2] sm:$0xff]  ;;  %s241_s18 = sshll.u32 %s306_s13, 3 }
   0xd   : > { %170 = vperm.xlu0 %254, %v167_v0   ;;  %s161_s21 = scalar_lea.vmem %s301_s0, %s241_s18  ;;  %s165_s24 = scalar_lea.vmem %s304_s3, %s241_s18 }
   0xe   : > { %v166_v4 = vld [vmem:[%s161_s21] sm:$0xff] }
  0x11   : > { %177 = vperm.xlu0 %254, %v174_v2  }
  0x88   : > { %v171_v3 = vpop.permute.xlu0 %170 }
  0x89   : > { %v173_v5 = vmul.f32 %v171_v3, %v166_v4 }
  0x8c   : > { %v178_v6 = vpop.permute.xlu0 %177 }
  0x8d   : > { %v180_v7 = vadd.f32 %v178_v6, %v173_v5 }
  0x8f   : > { %182 = vst.msk [vmem:[%s165_s24] sm:$0xff] %vm181_vm0, %v180_v7 }
  0x90 PF: > { %s13_s12 = sadd.s32 1, %s261_s12  }
  0x91   : > { %p10_p4 = scmp.ge.s32.totalorder %s13_s12, 4  }
  0x93   :  { %12 = sbr.rel (!%p10_p4) target bundleno = 1 (0x1), region = 62 }

// kernel: decoder_block_forward.2
= control target key start
LH: loop header
LB: loop body
LE: loop exit
PB: predicated region body
PF: predicated region fallthrough
CT: control target
= control target key end

     0   :  { %s1542_s21 = smov 0   ;;  %s2074_s0 = inlined_call_operand.vmem [shape: f32[2,8,256], index: 0, kind: input, shape index: {}]   ;;  %s2075_s1 = inlined_call_operand.vmem [shape: f32[8,72], index: 1, kind: input, shape index: {}]   ;;  %s2076_s2 = inlined_call_operand.vmem [shape: f32[8,1], index: 2, kind: input, shape index: {}]   ;;  %s2077_s3 = inlined_call_operand.vmem [shape: f32[2,8,64], index: 3, kind: output, shape index: {0}]   ;;  %s2078_s4 = inlined_call_operand.vmem [shape: s32[2,8,64], index: 4, kind: output, shape index: {1}]   ;;  %s2079_s5 = inlined_call_operand.vmem [shape: f32[2,8,1], index: 5, kind: output, shape index: {2}]   ;;  %s2080_s6 = inlined_call_operand.vmem [shape: f32[2,8,1], index: 6, kind: output, shape index: {3}]  }
   0x1 LB: > { %s1216_s22 = sadd.s32 4294967295, %s1493_s21   ;;  %p1220_p0 = scmp.ge.s32.totalorder %s1493_s21, 1  ;;  %s1493_s21 = sphi %s1542_s21, %s17_s21  }
   0x2   : > { %p219_p1 = scmp.lt.s32.totalorder %s1493_s21, 3 }
   0x4   : > { %p220_p2 = pnand %p1220_p0, %p219_p1 }
   0x5   : > { %p260_p3 = scmp.lt.s32.totalorder (!%p220_p2), %s1216_s22, 1  ;;  %s1496_s23 = smov (!%p220_p2), 111  }
   0x6   : > { %223 = sbr.rel (%p220_p2) target bundleno = 1300 (0x514), region = 32  ;;  %s1497_s28 = smov (!%p220_p2), 112  }
   0x7   : > { %s1498_s29 = smov (!%p220_p2), 113   ;;  %s1499_s30 = smov (!%p220_p2), 127  }
   0x8   : > { %s1500_s7 = smov (!%p220_p2), 1   ;;  %s1501_s8 = smov (!%p220_p2), 15  }
   0x9   : > { %s1502_s9 = smov (!%p220_p2), 16   ;;  %s1504_s10 = smov (!%p220_p2), 17  }
   0xb   : > { %v1495_v0 = vmov 0.0   ;;  %s2094_s22 = smov (!%p260_p3, %s1216_s22), 1  ;;  %v1503_v3 = vmov 0   ;;  %v474_v4 = vld [vmem:[%s2076_s2] sm:$0xff]  ;;  %v283_v5 = vlaneseq  ;;  %vm466_vm8 = vcmask 908288  }
   0xc   : > { %464 = vrot.lane.b32.xlu0 %v1495_v0, %s1496_s23  ;;  %548 = vmatprep.mubr.f32.mxu0 %v1495_v0  ;;  %s1317_s24 = sshll.u32 %s2094_s22, 4  ;;  %vm449_vm11 = vcmask 916480   ;;  %s2027_s15 = sshll.u32 %s2094_s22, 3 }
   0xd   : > { %s264_s27 = scalar_lea.vmem %s2074_s0, %s1317_s24  ;;  %1466 = vset.pattern.permute.xlu0 %v1503_v3  ;;  %v1598_v6 = vand.u32 127, %v283_v5  ;;  %s268_s18 = scalar_lea.vmem %s2077_s3, %s2027_s15 }
   0xe   : > { %v1559_v1 = vld [vmem:[%s264_s27 + $0x8] sm:$0xff]  ;;  %v1561_v2 = vld [vmem:[%s264_s27] sm:$0xff]  ;;  %s276_s22 = scalar_lea.vmem %s2079_s5, %s2027_s15  ;;  %s280_s25 = scalar_lea.vmem %s2080_s6, %s2027_s15 }
   0xf   : > { %460 = vrot.lane.b32.xlu1 %v1561_v2, %s1496_s23  ;;  %v285_v7 = vadd.s32 128, %v1598_v6  ;;  %v1602_v9 = vshra.s32 %v1598_v6, 4  ;;  %v288_v12 = vand.u32 15, %v1598_v6 }
  0x10   : > { %462 = vrot.lane.b32.xlu0 %v1559_v1, %s1496_s23 }
  0x11   : > { %v287_v8 = vshra.s32 %v285_v7, 4  ;;  %v289_v10 = vand.u32 15, %v285_v7  ;;  %v414_v13 = vadd.s32 1, %v1602_v9  ;;  %v1608_v15 = vadd.s32 1, %v288_v12 }
  0x12   : > { %v1632_v26 = vadd.s32 4294967295, %v288_v12  ;;  %v290_v44 = vadd.s32 4294967295, %v1602_v9 }
  0x13   : > { %445 = vrot.lane.b32.xlu1 %v1559_v1, %s1497_s28  ;;  %v415_v11 = vadd.s32 1, %v287_v8  ;;  %v1606_v14 = vadd.s32 1, %v289_v10  ;;  %vm416_vm2 = vcmp.ge.s32.totalorder %v414_v13, 0  ;;  %vm418_vm3 = vcmp.lt.s32.totalorder %v414_v13, 16 }
  0x14   : > { %447 = vrot.lane.b32.xlu0 %v1495_v0, %s1497_s28  ;;  %vm351_vm6 = vcmp.lt.s32.totalorder %v1608_v15, 16  ;;  %vm1616_vm7 = vmand %vm416_vm2, %vm418_vm3  ;;  %v1630_v23 = vadd.s32 4294967295, %v289_v10  ;;  %vm300_vm13 = vcmp.ge.s32.totalorder %v1632_v26, 0  ;;  %vm369_vm14 = vcmp.ge.s32.totalorder %v287_v8, 0 }
  0x15   : > { %vm417_vm0 = vcmp.ge.s32.totalorder %v415_v11, 0  ;;  %vm419_vm1 = vcmp.lt.s32.totalorder %v415_v11, 16  ;;  %vm352_vm4 = vcmp.lt.s32.totalorder %v1606_v14, 16  ;;  %vm458_vm10 = vmand %vm1616_vm7, %vm351_vm6  ;;  %vm371_vm15 = vcmp.lt.s32.totalorder %v287_v8, 16 }
  0x16   : > { %vm1611_vm5 = vmand %vm417_vm0, %vm419_vm1  ;;  %vm301_vm12 = vcmp.ge.s32.totalorder %v1630_v23, 0  ;;  %vm432_vm0 = vcmask 924672   ;;  %v291_v40 = vadd.s32 4294967295, %v287_v8 }
  0x17   : > { %443 = vrot.lane.b32.xlu1 %v1561_v2, %s1497_s28  ;;  %vm459_vm9 = vmand %vm1611_vm5, %vm352_vm4  ;;  %s272_s28 = scalar_lea.vmem %s2078_s4, %s2027_s15 }
  0x18   : > { %428 = vrot.lane.b32.xlu0 %v1559_v1, %s1498_s29  ;;  %vm423_vm1 = vmand %vm1611_vm5, %vm301_vm12 }
  0x19   : > { %vm422_vm2 = vmand %vm1616_vm7, %vm300_vm13 }
  0x1a   : > { %vm1648_vm3 = vmand %vm369_vm14, %vm371_vm15  ;;  %vm293_vm15 = vcmp.ge.s32.totalorder %v291_v40, 0 }
  0x1b   : > { %430 = vrot.lane.b32.xlu1 %v1495_v0, %s1498_s29 }
  0x1c   : > { %426 = vrot.lane.b32.xlu0 %v1561_v2, %s1498_s29 }
  0x1f   : > { %403 = vrot.lane.b32.xlu1 %v1559_v1, %s1499_s30 }
  0x20   : > { %405 = vrot.lane.b32.xlu0 %v1495_v0, %s1499_s30 }
  0x23   : > { %401 = vrot.lane.b32.xlu1 %v1561_v2, %s1499_s30 }
  0x24   : > { %380 = vrot.lane.b32.xlu0 %v1561_v2, %s1500_s7 }
  0x27   : > { %382 = vrot.lane.b32.xlu1 %v1559_v1, %s1500_s7 }
  0x28   : > { %378 = vrot.lane.b32.xlu0 %v1495_v0, %s1500_s7 }
  0x2b   : > { %357 = vrot.lane.b32.xlu1 %v1561_v2, %s1501_s8 }
  0x2c   : > { %359 = vrot.lane.b32.xlu0 %v1559_v1, %s1501_s8 }
  0x2f   : > { %355 = vrot.lane.b32.xlu1 %v1495_v0, %s1501_s8 }
  0x30   : > { %334 = vrot.lane.b32.xlu0 %v1561_v2, %s1502_s9 }
  0x33   : > { %336 = vrot.lane.b32.xlu1 %v1559_v1, %s1502_s9 }
  0x34   : > { %332 = vrot.lane.b32.xlu0 %v1495_v0, %s1502_s9 }
  0x37   : > { %313 = vrot.lane.b32.xlu1 %v1561_v2, %s1504_s10 }
  0x38   : > { %315 = vrot.lane.b32.xlu0 %v1559_v1, %s1504_s10 }
  0x3b   : > { %311 = vrot.lane.b32.xlu1 %v1495_v0, %s1504_s10 }
  0x3c   : > { %477 = vperm.xlu0 %1466, %v474_v4  }
  0x7e   : > { %v465_v16 = vpop.permute.xlu0 %464 }
  0x81   : > { %v461_v20 = vpop.permute.xlu1 %460 }
  0x82   : > { %v463_v19 = vpop.permute.xlu0 %462 }
  0x83   : > { %v468_v21 = vsel %vm466_vm8, %v463_v19, %v465_v16  ;;  %v467_v22 = vsel %vm466_vm8, %v461_v20, %v463_v19  ;;  %v681_v20 = vshra.s32 %v1598_v6, 3 }
  0x84   : > { %1227 = vmatprep.subr.msk.mxu0 %vm459_vm9, %v468_v21  ;;  %vm368_vm9 = vcmp.ge.s32.totalorder %v1602_v9, 0  ;;  %v682_v21 = vand.u32 7, %v1598_v6 }
  0x85   : > { %1228 = vmatpush1.msk.msra.mxu0 %vm458_vm10, %v467_v22  ;;  %v446_v25 = vpop.permute.xlu1 %445  ;;  %vm370_vm10 = vcmp.lt.s32.totalorder %v1602_v9, 16  ;;  %v683_v22 = vmul.u32 32, %v681_v20 }
  0x86   : > { %v448_v24 = vpop.permute.xlu0 %447  ;;  %v684_v23 = vmul.u32 2, %v682_v21 }
  0x87   : > { %v451_v27 = vsel %vm449_vm11, %v446_v25, %v448_v24 }
  0x88   : > { %1229 = vmatprep.subr.msk.mxu0 %vm1611_vm5, %v451_v27  ;;  %vm400_vm5 = vmand %vm1648_vm3, %vm352_vm4  ;;  %v1761_v27 = vadd.s32 %v684_v23, %v683_v22 }
  0x89   : > { %v444_v29 = vpop.permute.xlu1 %443 }
  0x8a   : > { %v429_v28 = vpop.permute.xlu0 %428  ;;  %v450_v30 = vsel %vm449_vm11, %v444_v29, %v446_v25  ;;  %vm407_vm11 = vcmask 1039360   ;;  %v1752_v25 = vshrl.u32 %v283_v5, 7 }
  0x8b   : > { %1230 = vmatpush1.msk.msra.mxu0 %vm1616_vm7, %v450_v30  ;;  %vm1658_vm7 = vmand %vm368_vm9, %vm370_vm10 }
  0x8c   : > { %vm399_vm14 = vmand %vm1658_vm7, %vm351_vm6  ;;  %v680_v29 = vadd.s32 248, %v1752_v25  ;;  %v664_v5 = vadd.s32 120, %v1752_v25  ;;  %v679_v30 = vadd.s32 240, %v1752_v25  ;;  %v663_v33 = vadd.s32 112, %v1752_v25 }
  0x8d   : > { %v431_v32 = vpop.permute.xlu1 %430  ;;  %vm374_vm9 = vmand %vm1658_vm7, %vm300_vm13  ;;  %v662_v38 = vadd.s32 104, %v1752_v25  ;;  %v673_v47 = vadd.s32 192, %v1752_v25  ;;  %v655_v52 = vadd.s32 48, %v1752_v25 }
  0x8e   : > { %v427_v31 = vpop.permute.xlu0 %426  ;;  %v434_v35 = vsel %vm432_vm0, %v429_v28, %v431_v32 }
  0x8f   : > { %v433_v34 = vsel %vm432_vm0, %v427_v31, %v429_v28  ;;  %1231 = vmatprep.subr.msk.mxu0 %vm423_vm1, %v434_v35  ;;  %vm295_vm0 = vcmp.lt.s32.totalorder %v291_v40, 16  ;;  %vm384_vm1 = vcmask 7168   ;;  %v661_v40 = vadd.s32 96, %v1752_v25 }
  0x90   : > { %1232 = vmatpush1.msk.msra.mxu0 %vm422_vm2, %v433_v34  ;;  %vm375_vm2 = vmand %vm1648_vm3, %vm301_vm12  ;;  %v678_v34 = vadd.s32 232, %v1752_v25 }
  0x91   : > { %v404_v37 = vpop.permute.xlu1 %403  ;;  %vm1681_vm10 = vmand %vm293_vm15, %vm295_vm0  ;;  %vm317_vm0 = vcmask 138240  }
  0x92   : > { %v406_v36 = vpop.permute.xlu0 %405 }
  0x93   : > { %v409_v39 = vsel %vm407_vm11, %v404_v37, %v406_v36 }
  0x94   : > { %1233 = vmatprep.subr.msk.mxu0 %vm400_vm5, %v409_v39  ;;  %vm361_vm5 = vcmask 121856   ;;  %v677_v39 = vadd.s32 224, %v1752_v25 }
  0x95   : > { %v402_v42 = vpop.permute.xlu1 %401 }
  0x96   : > { %v381_v41 = vpop.permute.xlu0 %380  ;;  %v408_v43 = vsel %vm407_vm11, %v402_v42, %v404_v37  ;;  %vm294_vm11 = vcmp.lt.s32.totalorder %v290_v44, 16  ;;  %v1505_v37 = vmov 1.0   ;;  %v660_v42 = vadd.s32 88, %v1752_v25 }
  0x97   : > { %1234 = vmatpush1.msk.msra.mxu0 %vm399_vm14, %v408_v43  ;;  %vm354_vm14 = vmand %vm1681_vm10, %vm352_vm4  ;;  %vm338_vm4 = vcmask 130048   ;;  %v675_v43 = vadd.s32 208, %v1752_v25 }
  0x98   : > { %1235 = vmatprep.subr.msk.mxu0 %vm1648_vm3, %v1559_v1  ;;  %vm292_vm3 = vcmp.ge.s32.totalorder %v290_v44, 0  ;;  %v659_v44 = vadd.s32 80, %v1752_v25 }
  0x99   : > { %v383_v46 = vpop.permute.xlu1 %382  ;;  %1236 = vmatpush1.msk.msra.mxu0 %vm1658_vm7, %v1561_v2  ;;  %vm1691_vm7 = vmand %vm292_vm3, %vm294_vm11  ;;  %v473_v2 = vld [vmem:[%s2075_s1] sm:$0xff] }
  0x9a   : > { %v379_v45 = vpop.permute.xlu0 %378  ;;  %v386_v49 = vsel %vm384_vm1, %v381_v41, %v383_v46  ;;  %vm353_vm15 = vmand %vm1691_vm7, %vm351_vm6  ;;  %v658_v46 = vadd.s32 72, %v1752_v25 }
  0x9b   : > { %v385_v48 = vsel %vm384_vm1, %v379_v45, %v381_v41  ;;  %1237 = vmatprep.subr.msk.mxu0 %vm375_vm2, %v386_v49  ;;  %vm303_vm6 = vmand %vm1681_vm10, %vm301_vm12  ;;  %v676_v41 = vadd.s32 216, %v1752_v25  ;;  %v674_v45 = vadd.s32 200, %v1752_v25  ;;  %v672_v49 = vadd.s32 184, %v1752_v25 }
  0x9c   : > { %1238 = vmatpush1.msk.msra.mxu0 %vm374_vm9, %v385_v48  ;;  %vm302_vm2 = vmand %vm1691_vm7, %vm300_vm13  ;;  %vm480_vm9 = vcmask 588800   ;;  %v657_v48 = vadd.s32 64, %v1752_v25 }
  0x9d   : > { %v358_v51 = vpop.permute.xlu1 %357 }
  0x9e   : > { %v360_v50 = vpop.permute.xlu0 %359 }
  0x9f   : > { %v363_v53 = vsel %vm361_vm5, %v358_v51, %v360_v50  ;;  %v656_v50 = vadd.s32 56, %v1752_v25 }
  0xa0   : > { %1239 = vmatprep.subr.msk.mxu0 %vm354_vm14, %v363_v53  ;;  %v670_v53 = vadd.s32 168, %v1752_v25 }
  0xa1   : > { %v356_v55 = vpop.permute.xlu1 %355 }
  0xa2   : > { %v335_v54 = vpop.permute.xlu0 %334  ;;  %v362_v56 = vsel %vm361_vm5, %v356_v55, %v358_v51  ;;  %v671_v51 = vadd.s32 176, %v1752_v25  ;;  %v669_v55 = vadd.s32 160, %v1752_v25 }
  0xa3   : > { %1240 = vmatpush1.msk.msra.mxu0 %vm353_vm15, %v362_v56  ;;  %vm701_vm15 = vcmp.eq.s32.totalorder %v664_v5, %v1761_v27  ;;  %v653_v56 = vadd.s32 32, %v1752_v25 }
  0xa5   : > { %v337_v58 = vpop.permute.xlu1 %336 }
  0xa6   : > { %v333_v57 = vpop.permute.xlu0 %332  ;;  %v340_v60 = vsel %vm338_vm4, %v335_v54, %v337_v58  ;;  %v652_v58 = vadd.s32 24, %v1752_v25 }
  0xa7   : > { %v339_v59 = vsel %vm338_vm4, %v333_v57, %v335_v54  ;;  %1241 = vmatprep.subr.msk.mxu0 %vm1681_vm10, %v340_v60  ;;  %vm716_vm4 = vcmp.eq.s32.totalorder %v679_v30, %v1761_v27  ;;  %v654_v54 = vadd.s32 40, %v1752_v25  ;;  %v668_v57 = vadd.s32 152, %v1752_v25 }
  0xa8   : > { %1242 = vmatpush1.msk.msra.mxu0 %vm1691_vm7, %v339_v59  ;;  %vm717_vm7 = vcmp.eq.s32.totalorder %v680_v29, %v1761_v27  ;;  %v667_v59 = vadd.s32 144, %v1752_v25  ;;  %v651_v60 = vadd.s32 16, %v1752_v25 }
  0xa9   : > { %v314_v62 = vpop.permute.xlu1 %313  ;;  %1318 = vmatprep.subr.msk.mxu1 %vm717_vm7, %v1505_v37 }
  0xaa   : > { %v316_v61 = vpop.permute.xlu0 %315  ;;  %1319 = vmatpush3.msk.msra.mxu1 %vm701_vm15, %v1505_v37 }
  0xab   : > { %v319_v63 = vsel %vm317_vm0, %v314_v62, %v316_v61  ;;  %1320 = vmatprep.subr.msk.mxu1 %vm716_vm4, %v1505_v37  ;;  %v666_v61 = vadd.s32 136, %v1752_v25 }
  0xac   : > { %1243 = vmatprep.subr.msk.mxu0 %vm303_vm6, %v319_v63  ;;  %vm715_vm6 = vcmp.eq.s32.totalorder %v678_v34, %v1761_v27  ;;  %v665_v63 = vadd.s32 128, %v1752_v25 }
  0xad   : > { %v312_v1 = vpop.permute.xlu1 %311 }
  0xae   : > { %v318_v3 = vsel %vm317_vm0, %v312_v1, %v314_v62  ;;  %vm700_vm0 = vcmp.eq.s32.totalorder %v663_v33, %v1761_v27  ;;  %v650_v62 = vadd.s32 8, %v1752_v25 }
  0xaf   : > { %1244 = vmatpush1.msk.msra.mxu0 %vm302_vm2, %v318_v3  ;;  %vm699_vm2 = vcmp.eq.s32.totalorder %v662_v38, %v1761_v27  ;;  %1321 = vmatpush3.msk.msra.mxu1 %vm700_vm0, %v1505_v37 }
  0xb0   : > { %1245 = vmatmul.mubr.msk.f32.vlgmr.msra.gmra.mxu0 %vm480_vm9, %v473_v2  ;;  %1353 = vmatprep.subr.msk.mxu0 %vm717_vm7, %v1505_v37  ;;  %vm714_vm9 = vcmp.eq.s32.totalorder %v677_v39, %v1761_v27  ;;  %vm697_vm7 = vcmp.eq.s32.totalorder %v660_v42, %v1761_v27 }
  0xb1   : > { %1354 = vmatpush3.msk.msra.mxu0 %vm701_vm15, %v1505_v37  ;;  %1322 = vmatprep.subr.msk.mxu1 %vm715_vm6, %v1505_v37  ;;  %vm712_vm15 = vcmp.eq.s32.totalorder %v675_v43, %v1761_v27 }
  0xb2   : > { %1355 = vmatprep.subr.msk.mxu0 %vm716_vm4, %v1505_v37  ;;  %1323 = vmatpush3.msk.msra.mxu1 %vm699_vm2, %v1505_v37  ;;  %vm696_vm4 = vcmp.eq.s32.totalorder %v659_v44, %v1761_v27 }
  0xb3   : > { %1356 = vmatpush3.msk.msra.mxu0 %vm700_vm0, %v1505_v37  ;;  %1324 = vmatprep.subr.msk.mxu1 %vm714_vm9, %v1505_v37  ;;  %vm711_vm0 = vcmp.eq.s32.totalorder %v674_v45, %v1761_v27 }
  0xb4   : > { %1357 = vmatprep.subr.msk.mxu0 %vm715_vm6, %v1505_v37  ;;  %vm695_vm6 = vcmp.eq.s32.totalorder %v658_v46, %v1761_v27 }
  0xb5   : > { %1358 = vmatpush3.msk.msra.mxu0 %vm699_vm2, %v1505_v37  ;;  %vm710_vm2 = vcmp.eq.s32.totalorder %v673_v47, %v1761_v27 }
  0xb6   : > { %1359 = vmatprep.subr.msk.mxu0 %vm714_vm9, %v1505_v37  ;;  %vm694_vm9 = vcmp.eq.s32.totalorder %v657_v48, %v1761_v27 }
  0xb7   : > { %v478_v4 = vpop.permute.xlu0 %477 }
 0x170   : > { %v550_v7 = vpop.f32.mrf.mxu0 }
 0x171   : > { %v1716_v8 = vadd.f32 %v550_v7, %v478_v4 }
 0x172   : > { %v552_v9 = vpop.f32.mrf.mxu0 }
 0x173   : > { %557 = vrot.lane.b32.xlu1 %v1716_v8, %s1500_s7  ;;  %v1720_v10 = vadd.f32 %v552_v9, %v478_v4 }
 0x177   : > { %559 = vrot.lane.b32.xlu1 %v1720_v10, %s1500_s7 }
 0x1e5   : > { %v558_v11 = vpop.permute.xlu1 %557 }
 0x1e6   : > { %vm565_vm12 = vcmp.gt.f32.partialorder %v1716_v8, %v558_v11 }
 0x1e7   : > { %v568_v12 = vsel %vm565_vm12, %v1716_v8, %v558_v11  ;;  %v1737_v16 = vsel %vm565_vm12, 1.0, %v1495_v0  ;;  %vm698_vm12 = vcmp.eq.s32.totalorder %v661_v40, %v1761_v27 }
 0x1e8   : > { %577 = vrot.lane.b32.xlu0 %v568_v12, %s1501_s8  ;;  %1325 = vmatpush3.msk.msra.mxu1 %vm698_vm12, %v1505_v37 }
 0x1e9   : > { %v1727_v13 = vpop.permute.xlu1 %559  ;;  %1360 = vmatpush3.msk.msra.mxu0 %vm698_vm12, %v1505_v37  ;;  %vm709_vm12 = vcmp.eq.s32.totalorder %v672_v49, %v1761_v27 }
 0x1ea   : > { %v561_v14 = vsel %vm384_vm1, %v558_v11, %v1727_v13  ;;  %vm1246_vm13 = vcmp.lt.f32.partialorder %v1727_v13, 0.0 }
 0x1eb   : > { %v570_v15 = vsel %vm1246_vm13, 0.0, %v1727_v13  ;;  %vm566_vm10 = vcmp.gt.f32.partialorder %v1720_v10, %v561_v14  ;;  %v573_v7 = vsel %vm1246_vm13, 1.0, %v1495_v0  ;;  %vm918_vm13 = vcmask 523264  }
 0x1ec   : > { %581 = vrot.lane.b32.xlu0 %v570_v15, %s1501_s8  ;;  %v569_v17 = vsel %vm566_vm10, %v1720_v10, %v561_v14  ;;  %v1742_v18 = vsel %vm566_vm10, 1.0, %v1495_v0  ;;  %vm713_vm10 = vcmp.eq.s32.totalorder %v676_v41, %v1761_v27 }
 0x1ed   : > { %579 = vrot.lane.b32.xlu1 %v569_v17, %s1501_s8  ;;  %v1472_v19 = vpack.i.bf16 %v1742_v18, %v1737_v16  ;;  %1326 = vmatprep.subr.msk.mxu1 %vm713_vm10, %v1505_v37 }
 0x1ee   : > { %1327 = vmatpush3.msk.msra.mxu1 %vm697_vm7, %v1505_v37  ;;  %1361 = vmatprep.subr.msk.mxu0 %vm713_vm10, %v1505_v37  ;;  %vm693_vm10 = vcmp.eq.s32.totalorder %v656_v50, %v1761_v27 }
 0x1ef   : > { %1328 = vmatprep.subr.msk.mxu1 %vm712_vm15, %v1505_v37  ;;  %1362 = vmatpush3.msk.msra.mxu0 %vm697_vm7, %v1505_v37  ;;  %vm708_vm7 = vcmp.eq.s32.totalorder %v671_v51, %v1761_v27 }
 0x1f0   : > { %1329 = vmatpush3.msk.msra.mxu1 %vm696_vm4, %v1505_v37  ;;  %1363 = vmatprep.subr.msk.mxu0 %vm712_vm15, %v1505_v37  ;;  %vm692_vm15 = vcmp.eq.s32.totalorder %v655_v52, %v1761_v27 }
 0x1f1   : > { %1330 = vmatprep.subr.msk.mxu1 %vm711_vm0, %v1505_v37  ;;  %1364 = vmatpush3.msk.msra.mxu0 %vm696_vm4, %v1505_v37  ;;  %vm707_vm4 = vcmp.eq.s32.totalorder %v670_v53, %v1761_v27 }
 0x1f2   : > { %1331 = vmatpush3.msk.msra.mxu1 %vm695_vm6, %v1505_v37  ;;  %1365 = vmatprep.subr.msk.mxu0 %vm711_vm0, %v1505_v37  ;;  %vm691_vm0 = vcmp.eq.s32.totalorder %v654_v54, %v1761_v27 }
 0x1f3   : > { %1332 = vmatprep.subr.msk.mxu1 %vm710_vm2, %v1505_v37  ;;  %1366 = vmatpush3.msk.msra.mxu0 %vm695_vm6, %v1505_v37  ;;  %vm706_vm6 = vcmp.eq.s32.totalorder %v669_v55, %v1761_v27 }
 0x1f4   : > { %1333 = vmatpush3.msk.msra.mxu1 %vm694_vm9, %v1505_v37  ;;  %1367 = vmatprep.subr.msk.mxu0 %vm710_vm2, %v1505_v37  ;;  %vm690_vm2 = vcmp.eq.s32.totalorder %v653_v56, %v1761_v27 }
 0x1f5   : > { %1334 = vmatprep.subr.msk.mxu1 %vm709_vm12, %v1505_v37  ;;  %1368 = vmatpush3.msk.msra.mxu0 %vm694_vm9, %v1505_v37  ;;  %vm705_vm9 = vcmp.eq.s32.totalorder %v668_v57, %v1761_v27 }
 0x1f6   : > { %1335 = vmatpush3.msk.msra.mxu1 %vm693_vm10, %v1505_v37  ;;  %1369 = vmatprep.subr.msk.mxu0 %vm709_vm12, %v1505_v37  ;;  %vm689_vm12 = vcmp.eq.s32.totalorder %v652_v58, %v1761_v27 }
 0x1f7   : > { %1336 = vmatprep.subr.msk.mxu1 %vm708_vm7, %v1505_v37  ;;  %1370 = vmatpush3.msk.msra.mxu0 %vm693_vm10, %v1505_v37  ;;  %vm704_vm10 = vcmp.eq.s32.totalorder %v667_v59, %v1761_v27 }
 0x1f8   : > { %1371 = vmatprep.subr.msk.mxu0 %vm708_vm7, %v1505_v37  ;;  %1337 = vmatpush3.msk.msra.mxu1 %vm692_vm15, %v1505_v37  ;;  %vm688_vm7 = vcmp.eq.s32.totalorder %v651_v60, %v1761_v27 }
 0x1f9   : > { %1372 = vmatpush3.msk.msra.mxu0 %vm692_vm15, %v1505_v37  ;;  %1338 = vmatprep.subr.msk.mxu1 %vm707_vm4, %v1505_v37  ;;  %vm703_vm15 = vcmp.eq.s32.totalorder %v666_v61, %v1761_v27 }
 0x1fa   : > { %1373 = vmatprep.subr.msk.mxu0 %vm707_vm4, %v1505_v37  ;;  %1339 = vmatpush3.msk.msra.mxu1 %vm691_vm0, %v1505_v37  ;;  %vm687_vm4 = vcmp.eq.s32.totalorder %v650_v62, %v1761_v27 }
 0x1fb   : > { %1374 = vmatpush3.msk.msra.mxu0 %vm691_vm0, %v1505_v37  ;;  %1340 = vmatprep.subr.msk.mxu1 %vm706_vm6, %v1505_v37  ;;  %vm686_vm0 = vcmp.eq.s32.totalorder %v1752_v25, %v1761_v27 }
 0x1fc   : > { %1375 = vmatprep.subr.msk.mxu0 %vm706_vm6, %v1505_v37  ;;  %1341 = vmatpush3.msk.msra.mxu1 %vm690_vm2, %v1505_v37  ;;  %vm702_vm6 = vcmp.eq.s32.totalorder %v665_v63, %v1761_v27 }
 0x1fd   : > { %1376 = vmatpush3.msk.msra.mxu0 %vm690_vm2, %v1505_v37  ;;  %1342 = vmatprep.subr.msk.mxu1 %vm705_vm9, %v1505_v37 }
 0x1fe   : > { %1377 = vmatprep.subr.msk.mxu0 %vm705_vm9, %v1505_v37  ;;  %1343 = vmatpush3.msk.msra.mxu1 %vm689_vm12, %v1505_v37 }
 0x1ff   : > { %1378 = vmatpush3.msk.msra.mxu0 %vm689_vm12, %v1505_v37  ;;  %1344 = vmatprep.subr.msk.mxu1 %vm704_vm10, %v1505_v37 }
 0x200   : > { %1379 = vmatprep.subr.msk.mxu0 %vm704_vm10, %v1505_v37  ;;  %1345 = vmatpush3.msk.msra.mxu1 %vm688_vm7, %v1505_v37 }
 0x201   : > { %1380 = vmatpush3.msk.msra.mxu0 %vm688_vm7, %v1505_v37  ;;  %1346 = vmatprep.subr.msk.mxu1 %vm703_vm15, %v1505_v37 }
 0x202   : > { %1381 = vmatprep.subr.msk.mxu0 %vm703_vm15, %v1505_v37  ;;  %1347 = vmatpush3.msk.msra.mxu1 %vm687_vm4, %v1505_v37 }
 0x203   : > { %1382 = vmatpush3.msk.msra.mxu0 %vm687_vm4, %v1505_v37  ;;  %1348 = vmatprep.subr.msk.mxu1 %vm702_vm6, %v1505_v37 }
 0x204   : > { %1383 = vmatprep.subr.msk.mxu0 %vm702_vm6, %v1505_v37  ;;  %1349 = vmatpush3.msk.msra.mxu1 %vm686_vm0, %v1505_v37 }
 0x205   : > { %1384 = vmatpush3.msk.msra.mxu0 %vm686_vm0, %v1505_v37  ;;  %1406 = vmatprep.subr.mxu1 %v1495_v0 }
 0x25a   : > { %v1749_v24 = vpop.permute.xlu0 %577 }
 0x25b   : > { %vm588_vm3 = vcmp.gt.f32.partialorder %v1716_v8, %v1749_v24 }
 0x25c   : > { %v591_v26 = vsel %vm588_vm3, %v1716_v8, %v1749_v24 }
 0x25d   : > { %614 = vrot.lane.b32.xlu1 %v591_v26, %s1500_s7 }
 0x25e   : > { %v582_v6 = vpop.permute.xlu0 %581 }
 0x25f   : > { %v580_v28 = vpop.permute.xlu1 %579 }
 0x260   : > { %v1769_v31 = vsel %vm361_vm5, %v1749_v24, %v580_v28  ;;  %v1772_v32 = vsel %vm361_vm5, %v580_v28, %v582_v6 }
 0x261   : > { %vm589_vm11 = vcmp.gt.f32.partialorder %v1720_v10, %v1769_v31  ;;  %vm1247_vm14 = vcmp.lt.f32.partialorder %v1772_v32, 0.0 }
 0x262   : > { %v593_v35 = vsel %vm1247_vm14, 0.0, %v1772_v32  ;;  %v592_v36 = vsel %vm589_vm11, %v1720_v10, %v1769_v31 }
 0x263   : > { %618 = vrot.lane.b32.xlu1 %v593_v35, %s1500_s7  ;;  %616 = vrot.lane.b32.xlu0 %v592_v36, %s1500_s7 }
 0x2cf   : > { %v1949_v1 = vpop.permute.xlu1 %614 }
 0x2d0   : > { %vm625_vm2 = vcmp.gt.f32.partialorder %v1716_v8, %v1949_v1 }
 0x2d1   : > { %v628_v2 = vsel %vm625_vm2, %v1716_v8, %v1949_v1 }
 0x2d2   : > { %753 = vrot.lane.b32.xlu1 %v628_v2, %s1496_s23 }
 0x2d5   : > { %v617_v3 = vpop.permute.xlu0 %616  ;;  %v619_v4 = vpop.permute.xlu1 %618 }
 0x2d6   : > { %v620_v9 = vsel %vm384_vm1, %v1949_v1, %v617_v3  ;;  %v621_v11 = vsel %vm384_vm1, %v617_v3, %v619_v4  ;;  %601 = vrot.lane.b32.xlu1 %v573_v7, %s1501_s8 }
 0x2d7   : > { %vm626_vm9 = vcmp.gt.f32.partialorder %v1720_v10, %v620_v9  ;;  %vm1248_vm12 = vcmp.lt.f32.partialorder %v621_v11, 0.0 }
 0x2d8   : > { %v629_v12 = vsel %vm626_vm9, %v1720_v10, %v620_v9  ;;  %v630_v14 = vsel %vm1248_vm12, 0.0, %v621_v11 }
 0x2d9   : > { %v1467_v15 = vpack.i.bf16 %v630_v14, %v629_v12 }
 0x2db   : > { %1468 = vrot.lane.b32.xlu0 %v1467_v15, %s1496_s23 }
 0x2df   : > { %1473 = vrot.lane.b32.xlu0 %v1472_v19, %s1501_s8 }
 0x344   : > { %v754_v13 = vpop.permute.xlu1 %753 }
 0x348   : > { %v602_v28 = vpop.permute.xlu1 %601 }
 0x34d   : > { %v1469_v17 = vpop.permute.xlu0 %1468 }
 0x34e   : > { %v1471_v20 = vunpack.i.h.bf16 %v1469_v17  ;;  %v1470_v21 = vunpack.i.l.bf16 %v1469_v17 }
 0x350   : > { %v760_v22 = vsel %vm466_vm8, %v1470_v21, %v1471_v20  ;;  %v759_v23 = vsel %vm466_vm8, %v754_v13, %v1470_v21 }
 0x351   : > { %v1474_v25 = vpop.permute.xlu0 %1473  ;;  %827 = vmatprep.mubr.f32.mxu1 %v760_v22 }
 0x352   : > { %v1476_v26 = vunpack.i.h.bf16 %v1474_v25  ;;  %v1475_v6 = vunpack.i.l.bf16 %v1474_v25  ;;  %828 = vmatmul.mubr.f32.vlgmr.msra.gmra.mxu1 %v759_v23 }
 0x353   : > { %1407 = vmatpush3.msra.mxu1 %v1505_v37 }
 0x354   : > { %v608_v16 = vsel %vm588_vm3, 16.0, %v1475_v6  ;;  %v604_v18 = vsel %vm361_vm5, %v1476_v26, %v602_v28  ;;  %v603_v19 = vsel %vm361_vm5, %v1475_v6, %v1476_v26  ;;  %1408 = vmatprep.subr.mxu1 %v1495_v0  ;;  %vm1506_vm5 = vmmov 0  }
 0x355   : > { %v610_v29 = vsel %vm1247_vm14, 16.0, %v604_v18  ;;  %v609_v5 = vsel %vm589_vm11, 16.0, %v603_v19  ;;  %1409 = vmatpush3.msra.mxu1 %v1505_v37  ;;  %1422 = vmatprep.mubr.msk.f32.mxu1 %vm1506_vm5, %v1495_v0 }
 0x356   : > { %638 = vrot.lane.b32.xlu1 %v610_v29, %s1500_s7  ;;  %v1477_v30 = vpack.i.bf16 %v609_v5, %v608_v16  ;;  %1410 = vmatprep.subr.mxu1 %v1495_v0 }
 0x357   : > { %1411 = vmatpush3.msra.mxu1 %v1505_v37 }
 0x358   : > { %1478 = vrot.lane.b32.xlu0 %v1477_v30, %s1500_s7  ;;  %1412 = vmatprep.subr.mxu1 %v1495_v0 }
 0x359   : > { %1413 = vmatpush3.msra.mxu1 %v1505_v37 }
 0x35a   : > { %1414 = vmatprep.subr.mxu1 %v1495_v0 }
 0x35b   : > { %1415 = vmatpush3.msra.mxu1 %v1505_v37 }
 0x35c   : > { %1416 = vmatprep.subr.mxu1 %v1495_v0 }
 0x35d   : > { %1417 = vmatpush3.msra.mxu1 %v1505_v37 }
 0x35e   : > { %1418 = vmatprep.subr.mxu1 %v1495_v0 }
 0x35f   : > { %1419 = vmatpush3.msra.mxu1 %v1505_v37 }
 0x360   : > { %1420 = vmatprep.subr.mxu1 %v1495_v0 }
 0x361   : > { %1421 = vmatpush3.msra.mxu1 %v1505_v37 }
 0x362   : > { %1425 = vmatprep.subr.mxu1 %v1495_v0 }
 0x3c8   : > { %v639_v33 = vpop.permute.xlu1 %638 }
 0x3ca   : > { %v1479_v24 = vpop.permute.xlu0 %1478 }
 0x3cb   : > { %v1481_v31 = vunpack.i.h.bf16 %v1479_v24  ;;  %v1480_v32 = vunpack.i.l.bf16 %v1479_v24 }
 0x3cd   : > { %v645_v34 = vsel %vm625_vm2, 17.0, %v1480_v32  ;;  %v640_v35 = vsel %vm384_vm1, %v1480_v32, %v1481_v31  ;;  %v641_v36 = vsel %vm384_vm1, %v1481_v31, %v639_v33 }
 0x3ce   : > { %836 = vrot.lane.b32.xlu1 %v645_v34, %s1496_s23  ;;  %v646_v38 = vsel %vm626_vm9, 17.0, %v640_v35  ;;  %v647_v39 = vsel %vm1248_vm12, 17.0, %v641_v36 }
 0x3cf   : > { %v1482_v40 = vpack.i.bf16 %v647_v39, %v646_v38 }
 0x3d1   : > { %1483 = vrot.lane.b32.xlu0 %v1482_v40, %s1496_s23 }
 0x412   : > { %v1350_v41 = vpop.f32.mrf.mxu1 }
 0x414   : > { %v1351_v8 = vpop.f32.mrf.mxu1 }
 0x415   : > { %v1352_v42 = vadd.f32 %v1351_v8, %v1350_v41 }
 0x417   : > { %919 = vst.msk [vmem:[%s268_s18] sm:$0xff] %vm918_vm13, %v1352_v42  ;;  %1423 = vmatmul.mubr.msk.f32.vlgmr.msra.gmra.mxu1 %vm918_vm13, %v1352_v42  ;;  %v995_v10 = vmul.f32 %v1352_v42, %v1352_v42 }
 0x418   : > { %1426 = vmatpush3.msra.mxu1 %v1505_v37  ;;  %1441 = vmatprep.mubr.msk.f32.mxu1 %vm1506_vm5, %v1495_v0 }
 0x419   : > { %1427 = vmatprep.subr.mxu1 %v1495_v0 }
 0x41a   : > { %1428 = vmatpush3.msra.mxu1 %v1505_v37 }
 0x41b   : > { %1429 = vmatprep.subr.mxu1 %v1495_v0 }
 0x41c   : > { %1430 = vmatpush3.msra.mxu1 %v1505_v37 }
 0x41d   : > { %1431 = vmatprep.subr.mxu1 %v1495_v0 }
 0x41e   : > { %1432 = vmatpush3.msra.mxu1 %v1505_v37 }
 0x41f   : > { %1433 = vmatprep.subr.mxu1 %v1495_v0 }
 0x420   : > { %1434 = vmatpush3.msra.mxu1 %v1505_v37 }
 0x421   : > { %1435 = vmatprep.subr.mxu1 %v1495_v0 }
 0x422   : > { %1436 = vmatpush3.msra.mxu1 %v1505_v37 }
 0x423   : > { %1437 = vmatprep.subr.mxu1 %v1495_v0 }
 0x424   : > { %1438 = vmatpush3.msra.mxu1 %v1505_v37 }
 0x425   : > { %1439 = vmatprep.subr.mxu1 %v1495_v0 }
 0x426   : > { %1440 = vmatpush3.msra.mxu1 %v1505_v37 }
 0x427   : > { %1442 = vmatmul.mubr.msk.f32.vlgmr.msra.gmra.mxu1 %vm918_vm13, %v995_v10 }
 0x440   : > { %v837_v46 = vpop.permute.xlu1 %836 }
 0x443   : > { %v1484_v43 = vpop.permute.xlu0 %1483 }
 0x444   : > { %v1486_v44 = vunpack.i.h.bf16 %v1484_v43  ;;  %v1485_v45 = vunpack.i.l.bf16 %v1484_v43 }
 0x446   : > { %v843_v47 = vsel %vm466_vm8, %v1485_v45, %v1486_v44  ;;  %v842_v48 = vsel %vm466_vm8, %v837_v46, %v1485_v45 }
 0x447   : > { %910 = vmatprep.mubr.f32.mxu0 %v843_v47 }
 0x448   : > { %911 = vmatmul.mubr.f32.vlgmr.msra.gmra.mxu0 %v842_v48 }
 0x4d7   : > { %v990_v0 = vpop.f32.mrf.mxu1 }
 0x4d8   : > { %994 = vst.msk [vmem:[%s276_s22] sm:$0xff] %vm384_vm1, %v990_v0 }
 0x4d9   : > { %v1424_v37 = vpop.f32.mrf.mxu1 }
 0x4e7   : > { %v1065_v49 = vpop.f32.mrf.mxu1 }
 0x4e8   : > { %1069 = vst.msk [vmem:[%s280_s25] sm:$0xff] %vm384_vm1, %v1065_v49 }
 0x4e9   : > { %v1443_v50 = vpop.f32.mrf.mxu1 }
 0x508   : > { %v1385_v51 = vpop.f32.mrf.mxu0 }
 0x50a   : > { %v1386_v52 = vpop.f32.mrf.mxu0 }
 0x50b   : > { %v1387_v53 = vadd.f32 %v1386_v52, %v1385_v51 }
 0x50d   : > { %v1444_v54 = vtrunc.f32 %v1387_v53 }
 0x50f   : > { %v1445_v55 = vcvt.f32.s32 %v1444_v54 }
 0x511   : > { %v917_v56 = vadd.s32 %v1445_v55, %v1761_v27 }
 0x513   : > { %920 = vst.msk [vmem:[%s272_s28] sm:$0xff] %vm918_vm13, %v917_v56 }
 0x514 PF: > { %s17_s21 = sadd.s32 1, %s1493_s21  }
 0x515   : > { %p14_p4 = scmp.ge.s32.totalorder %s17_s21, 4  }
 0x517   :  { %16 = sbr.rel (!%p14_p4) target bundleno = 1 (0x1), region = 98 }

</bundles_post_ra>
